<compile_context>
chip_gen: v7x
topology: tpu7x:2x2x1
jax: 0.10.0
libtpu: 0.0.40
codegen_flags: <defaults>
</compile_context>

<pallas_src>
import jax
import jax.numpy as jnp
from jax.experimental import pallas as pl
from jax.experimental.pallas import tpu as pltpu  # noqa: F401  (TPU backend)

HID = 768          # self.hid_num = 768
NUM_CLASSES = 3    # nn.Linear(768, 3)
LANE = 128         # lane-dense output width
VOCAB = 64         # synthetic vocab for the stand-in embedding table


def bert_vanilla_kernel(feat_ref, emb_ref, wp_ref, bp_ref, wf_ref, bf_ref,
                        out_ref, len_ref):
    feat = feat_ref[...]                                            # [B, S] int32
    B = feat.shape[0]

    # text_len = torch.sum(feature != 0, dim=-1); broadcast across 128 lanes so
    # the store is an unmasked vst (wrapper takes column 0).
    lens = jnp.sum((feat != 0).astype(jnp.int32), axis=-1, keepdims=True)  # [B,1]
    len_ref[...] = jnp.broadcast_to(lens, len_ref.shape)

    # Fused [CLS] embedding lookup: one-hot [B, VOCAB] @ table [VOCAB, HID] on
    # the MXU (exact, since one-hot rows select single bf16 table rows).
    cls_ids = feat[:, 0:1]                                          # [B, 1]
    vocab_iota = jax.lax.broadcasted_iota(jnp.int32, (B, VOCAB), 1)
    onehot = (vocab_iota == cls_ids).astype(jnp.bfloat16)           # [B, VOCAB]
    emb_cls = jnp.dot(onehot, emb_ref[...],
                      preferred_element_type=jnp.float32)           # [B, HID] f32

    # BERT pooler: tanh(emb_cls @ W_pool + b_pool) — bf16 MXU, f32 accumulate.
    pooled = jnp.tanh(
        jnp.dot(emb_cls.astype(jnp.bfloat16), wp_ref[...],
                preferred_element_type=jnp.float32)
        + bp_ref[...])                                              # [B, HID] f32

    # text_embed_dropout: nn.Dropout in eval mode == identity.
    # TODO(synk): training-mode dropout (pltpu.prng_random_bits mask) not emitted.

    # fc_out: pooled @ W_fc (128-lane padded) + b_fc -> [B, 128] (cols 3..127 = 0).
    out_ref[...] = (
        jnp.dot(pooled, wf_ref[...].astype(jnp.float32),
                preferred_element_type=jnp.float32)
        + bf_ref[...])


def bert_vanilla_forward(feature, emb_table, w_pool, b_pool, w_fc, b_fc):
    """feature: [B, S] token ids. Returns ([B, 3] logits, [B] text_len)."""
    feature = feature.astype(jnp.int32)                  # feature.long()
    B, S = feature.shape

    # Weight prep (one-time in a real deployment): bf16 storage + lane padding.
    emb_bf16 = emb_table.astype(jnp.bfloat16)            # [VOCAB, HID]
    wp_bf16 = w_pool.astype(jnp.bfloat16)                # [HID, HID]
    wf_pad = jnp.zeros((HID, LANE), jnp.bfloat16).at[:, :NUM_CLASSES].set(
        w_fc.astype(jnp.bfloat16))                       # [HID, 128]
    bf_pad = jnp.zeros((1, LANE), jnp.float32).at[0, :NUM_CLASSES].set(
        b_fc.astype(jnp.float32))                        # [1, 128]
    bp = b_pool.reshape(1, HID).astype(jnp.float32)      # [1, HID]

    full = lambda shape: pl.BlockSpec(shape, lambda: (0,) * len(shape))

    logits_pad, len_pad = pl.pallas_call(
        bert_vanilla_kernel,
        out_shape=(
            jax.ShapeDtypeStruct((B, LANE), jnp.float32),
            jax.ShapeDtypeStruct((B, LANE), jnp.int32),
        ),
        grid=(),
        in_specs=[
            full((B, S)),            # feature (int32)
            full((VOCAB, HID)),      # embedding table (bf16)
            full((HID, HID)),        # pooler weight (bf16)
            full((1, HID)),          # pooler bias (f32)
            full((HID, LANE)),       # fc weight, lane-padded (bf16)
            full((1, LANE)),         # fc bias, lane-padded (f32)
        ],
        out_specs=(
            full((B, LANE)),
            full((B, LANE)),
        ),
    )(feature, emb_bf16, wp_bf16, bp, wf_pad, bf_pad)

    return logits_pad[:, :NUM_CLASSES], len_pad[:, 0]


def reference_forward(feature, emb_table, w_pool, b_pool, w_fc, b_fc):
    # Mirrors the kernel's bf16 weight storage (rounded then cast back to f32)
    # so the comparison isolates kernel correctness from quantization shift.
    feature = feature.astype(jnp.int32)
    emb = emb_table.astype(jnp.bfloat16).astype(jnp.float32)
    wp = w_pool.astype(jnp.bfloat16).astype(jnp.float32)
    wf = w_fc.astype(jnp.bfloat16).astype(jnp.float32)
    emb_cls = jnp.take(emb, feature[:, 0], axis=0)
    pooled = jnp.tanh(emb_cls @ wp + b_pool)
    return pooled @ wf + b_fc


if __name__ == "__main__":
    key = jax.random.PRNGKey(0)
    k_feat, k_emb, k_wp, k_bp, k_wf, k_bf = jax.random.split(key, 6)

    B, S = 8, 16
    feature = jax.random.randint(k_feat, (B, S), minval=0, maxval=VOCAB,
                                 dtype=jnp.int32)
    # zero out a tail to exercise text_len = sum(feature != 0)
    feature = feature.at[:, S - 4:].set(0)

    emb_table = jax.random.normal(k_emb, (VOCAB, HID), dtype=jnp.float32) * 0.02
    w_pool = jax.random.normal(k_wp, (HID, HID), dtype=jnp.float32) * 0.02
    b_pool = jax.random.normal(k_bp, (HID,), dtype=jnp.float32) * 0.02
    w_fc = jax.random.normal(k_wf, (HID, NUM_CLASSES), dtype=jnp.float32) * 0.02
    b_fc = jax.random.normal(k_bf, (NUM_CLASSES,), dtype=jnp.float32) * 0.02

    logits, text_len = bert_vanilla_forward(feature, emb_table, w_pool, b_pool,
                                            w_fc, b_fc)
    logits = jax.block_until_ready(logits)
    text_len = jax.block_until_ready(text_len)

    ref = reference_forward(feature, emb_table, w_pool, b_pool, w_fc, b_fc)
    assert logits.shape == (B, NUM_CLASSES)
    assert jnp.allclose(logits, ref, atol=1e-3, rtol=1e-3)
    assert jnp.array_equal(
        text_len, jnp.sum(feature != 0, axis=-1).astype(jnp.int32))

    print("KERNEL_OK")
</pallas_src>

<mosaic_0001>
module attributes {stable_mosaic.version = 11 : i64} {
  func.func @bert_vanilla_kernel(%arg0: memref<8x16xi32, #tpu.memory_space<vmem>>, %arg1: memref<64x768xbf16, #tpu.memory_space<vmem>>, %arg2: memref<768x768xbf16, #tpu.memory_space<vmem>>, %arg3: memref<1x768xf32, #tpu.memory_space<vmem>>, %arg4: memref<768x128xbf16, #tpu.memory_space<vmem>>, %arg5: memref<1x128xf32, #tpu.memory_space<vmem>>, %arg6: memref<8x128xf32, #tpu.memory_space<vmem>>, %arg7: memref<8x128xi32, #tpu.memory_space<vmem>>) attributes {dimension_semantics = [], scalar_prefetch = 0 : i64, scratch_operands = 0 : i64, tpu.core_type = #tpu.core_type<tc>} {
    %c0 = arith.constant 0 : index
    %c0_0 = arith.constant 0 : index
    %0 = vector.load %arg0[%c0, %c0_0] : memref<8x16xi32, #tpu.memory_space<vmem>>, vector<8x16xi32>
    %c0_i32 = arith.constant 0 : i32
    %1 = vector.broadcast %c0_i32 : i32 to vector<8x16xi32>
    %2 = arith.cmpi ne, %0, %1 : vector<8x16xi32>
    %3 = arith.extui %2 : vector<8x16xi1> to vector<8x16xi32>
    %cst = arith.constant dense<0> : vector<8xi32>
    %4 = vector.multi_reduction <add>, %3, %cst [1] : vector<8x16xi32> to vector<8xi32>
    %5 = vector.shape_cast %4 : vector<8xi32> to vector<8x1xi32>
    %6 = vector.shape_cast %5 : vector<8x1xi32> to vector<8x1xi32>
    %7 = vector.broadcast %6 : vector<8x1xi32> to vector<8x128xi32>
    %c0_1 = arith.constant 0 : index
    %c0_2 = arith.constant 0 : index
    %8 = vector.load %arg7[%c0_1, %c0_2] : memref<8x128xi32, #tpu.memory_space<vmem>>, vector<8x128xi32>
    tpu.vector_store %arg7[%c0_1, %c0_2], %7 {strides = array<i32>} : memref<8x128xi32, #tpu.memory_space<vmem>>, vector<8x128xi32>,
    %9 = vector.extract_strided_slice %0 {offsets = [0, 0], sizes = [8, 1], strides = [1, 1]} : vector<8x16xi32> to vector<8x1xi32>
    %10 = tpu.iota {dimensions = array<i32: 1>} : vector<8x64xi32>
    %11 = vector.broadcast %9 : vector<8x1xi32> to vector<8x64xi32>
    %12 = arith.cmpi eq, %10, %11 : vector<8x64xi32>
    %13 = arith.extui %12 : vector<8x64xi1> to vector<8x64xi32>
    %14 = arith.sitofp %13 : vector<8x64xi32> to vector<8x64xf32>
    %15 = arith.truncf %14 : vector<8x64xf32> to vector<8x64xbf16>
    %c0_3 = arith.constant 0 : index
    %c0_4 = arith.constant 0 : index
    %16 = vector.load %arg1[%c0_3, %c0_4] : memref<64x768xbf16, #tpu.memory_space<vmem>>, vector<64x768xbf16>
    %cst_5 = arith.constant dense<0.000000e+00> : vector<8x768xf32>
    %17 = tpu.matmul %15, %16, %cst_5 {dimension_numbers = #tpu.dot_dimension_numbers<[1], [0], [0], [1], [0, 0, 1, 1], [], []>} : vector<8x64xbf16>, vector<64x768xbf16>, vector<8x768xf32> -> vector<8x768xf32>
    %18 = arith.truncf %17 : vector<8x768xf32> to vector<8x768xbf16>
    %c0_6 = arith.constant 0 : index
    %c0_7 = arith.constant 0 : index
    %19 = vector.load %arg2[%c0_6, %c0_7] : memref<768x768xbf16, #tpu.memory_space<vmem>>, vector<768x768xbf16>
    %cst_8 = arith.constant dense<0.000000e+00> : vector<8x768xf32>
    %20 = tpu.matmul %18, %19, %cst_8 {dimension_numbers = #tpu.dot_dimension_numbers<[1], [0], [0], [1], [0, 0, 1, 1], [], []>} : vector<8x768xbf16>, vector<768x768xbf16>, vector<8x768xf32> -> vector<8x768xf32>
    %c0_9 = arith.constant 0 : index
    %c0_10 = arith.constant 0 : index
    %21 = vector.load %arg3[%c0_9, %c0_10] : memref<1x768xf32, #tpu.memory_space<vmem>>, vector<1x768xf32>
    %22 = vector.broadcast %21 : vector<1x768xf32> to vector<8x768xf32>
    %23 = arith.addf %20, %22 : vector<8x768xf32>
    %24 = math.tanh %23 : vector<8x768xf32>
    %c0_11 = arith.constant 0 : index
    %c0_12 = arith.constant 0 : index
    %25 = vector.load %arg4[%c0_11, %c0_12] : memref<768x128xbf16, #tpu.memory_space<vmem>>, vector<768x128xbf16>
    %26 = arith.extf %25 : vector<768x128xbf16> to vector<768x128xf32>
    %cst_13 = arith.constant dense<0.000000e+00> : vector<8x128xf32>
    %27 = tpu.matmul %24, %26, %cst_13 {dimension_numbers = #tpu.dot_dimension_numbers<[1], [0], [0], [1], [0, 0, 1, 1], [], []>} : vector<8x768xf32>, vector<768x128xf32>, vector<8x128xf32> -> vector<8x128xf32>
    %c0_14 = arith.constant 0 : index
    %c0_15 = arith.constant 0 : index
    %28 = vector.load %arg5[%c0_14, %c0_15] : memref<1x128xf32, #tpu.memory_space<vmem>>, vector<1x128xf32>
    %29 = vector.broadcast %28 : vector<1x128xf32> to vector<8x128xf32>
    %30 = arith.addf %27, %29 : vector<8x128xf32>
    %c0_16 = arith.constant 0 : index
    %c0_17 = arith.constant 0 : index
    %31 = vector.load %arg6[%c0_16, %c0_17] : memref<8x128xf32, #tpu.memory_space<vmem>>, vector<8x128xf32>
    tpu.vector_store %arg6[%c0_16, %c0_17], %30 {strides = array<i32>} : memref<8x128xf32, #tpu.memory_space<vmem>>, vector<8x128xf32>,
    return
  }
}

</mosaic_0001>

<bundles_post_ra>
// kernel: tpu_custom_call.1
= control target key start
LH: loop header
LB: loop body
LE: loop exit
PB: predicated region body
PF: predicated region fallthrough
CT: control target
= control target key end

     0   :  { %13 = vsyncpa [#allocation3], 0  ;;  %s4676_s0 = inlined_call_operand.hbm [shape: s32[8,16], index: 0, kind: input, shape index: {}]   ;;  %s4677_s1 = inlined_call_operand.hbm [shape: bf16[64,768], index: 1, kind: input, shape index: {}]   ;;  %s4678_s2 = inlined_call_operand.hbm [shape: bf16[768,768], index: 2, kind: input, shape index: {}]   ;;  %s4679_s3 = inlined_call_operand.hbm [shape: f32[1,768], index: 3, kind: input, shape index: {}]   ;;  %s4680_s4 = inlined_call_operand.hbm [shape: bf16[768,128], index: 4, kind: input, shape index: {}]   ;;  %s4681_s5 = inlined_call_operand.hbm [shape: f32[1,128], index: 5, kind: input, shape index: {}]   ;;  %s4682_s6 = inlined_call_operand.hbm [shape: f32[8,128], index: 6, kind: output, shape index: {0}]   ;;  %s4683_s7 = inlined_call_operand.hbm [shape: s32[8,128], index: 7, kind: output, shape index: {1}]  }
   0x1   :  { %14 = vsyncpa [#allocation6], 0 }
   0x2   :  { %15 = vsyncpa [#allocation9], 0 }
   0x3   :  { %16 = vsyncpa [#allocation12], 0 }
   0x4   :  { %17 = vsyncpa [#allocation4], 0 }
   0x5   :  { %18 = vsyncpa [#allocation15], 0  ;;  %s4454_s24 = smov [#allocation5]   ;;  %s4266_s28 = scalar_lea.hbm %s4677_s1, 3072 }
   0x6   :  { %s34_s25 = sshll.u32 %s4454_s24, 4  ;;  %p4267_p0 = scmp.ne.s32.totalorder %s4677_s1, %s4266_s28  ;;  %s35_s25 = int_to_ptr.vmem [resolvable:$true] %s34_s25 }
   0x7   :  { %p4270_p1 = scmp.lt.u32.totalorder %s4266_s28, %s4677_s1 }
   0x9   :  { %p4272_p2 = pnand %p4270_p1, %p4267_p0 }
   0xb   :  { %4275 = shalt.err (!%p4272_p2)
}
   0xc   :  { %s4276_s10 = scalar_lea.vmem %s35_s25, 3072  ;;  %p4281_p4 = scmp.lt.s32.totalorder %s35_s25, %s35_s25 }
   0xd   :  { %p4277_p3 = scmp.ne.s32.totalorder %s35_s25, %s4276_s10  ;;  %p4282_p5 = scmp.lt.s32.totalorder %s4276_s10, %s4276_s10 }
   0xf   :  { %p4283_p6 = por %p4282_p5, %p4281_p4 }
  0x11   :  { %p4284_p7 = pnand %p4283_p6, %p4277_p3 }
  0x13   :  { %4287 = shalt.err (!%p4284_p7)
}
  0x14   :  { %s4455_s11 = smov 384   ;;  %s4456_s12 = smov 24  }
  0x15   :  { %40 = dma.hbm_to_vmem [thread:$0]  %s4677_s1, 3072, %s35_s25, [#allocation6], %s4455_s11, %s4455_s11, %s4456_s12  }
  0x16   :  { %s4457_s15 = smov [#allocation8]   ;;  %s4458_s17 = smov [#allocation2]  }
  0x17   :  { %s59_s16 = sshll.u32 %s4457_s15, 4  ;;  %s25_s18 = sshll.u32 %s4458_s17, 4  ;;  %s60_s16 = int_to_ptr.vmem [resolvable:$true] %s59_s16  ;;  %s26_s18 = int_to_ptr.vmem [resolvable:$true] %s25_s18 }
  0x18   :  { %s4288_s21 = scalar_lea.hbm %s4679_s3, 96 }
  0x19   :  { %p4289_p8 = scmp.ne.s32.totalorder %s4679_s3, %s4288_s21  ;;  %p4292_p9 = scmp.lt.u32.totalorder %s4288_s21, %s4679_s3 }
  0x1b   :  { %p4294_p10 = pnand %p4292_p9, %p4289_p8 }
  0x1d   :  { %4297 = shalt.err (!%p4294_p10)
}
  0x1e   :  { %s4298_s1 = scalar_lea.vmem %s60_s16, 96  ;;  %p4303_p12 = scmp.lt.s32.totalorder %s60_s16, %s60_s16 }
  0x1f   :  { %p4299_p11 = scmp.ne.s32.totalorder %s60_s16, %s4298_s1  ;;  %p4304_p13 = scmp.lt.s32.totalorder %s4298_s1, %s4298_s1 }
  0x21   :  { %p4305_p0 = por %p4304_p13, %p4303_p12 }
  0x23   :  { %p4306_p1 = pnand %p4305_p0, %p4299_p11 }
  0x25   :  { %4309 = shalt.err (!%p4306_p1)
}
  0x26   :  { %62 = dma.hbm_to_vmem [thread:$0]  %s4679_s3, 96, %s60_s16, [#allocation9]  }
  0x27   :  { %s4310_s30 = scalar_lea.hbm %s4676_s0, 128 }
  0x28   :  { %p4311_p2 = scmp.ne.s32.totalorder %s4676_s0, %s4310_s30  ;;  %p4314_p3 = scmp.lt.u32.totalorder %s4310_s30, %s4676_s0 }
  0x2a   :  { %p4316_p4 = pnand %p4314_p3, %p4311_p2 }
  0x2c   :  { %4319 = shalt.err (!%p4316_p4)
}
  0x2d   :  { %s4320_s14 = scalar_lea.vmem %s26_s18, 128  ;;  %p4325_p6 = scmp.lt.s32.totalorder %s26_s18, %s26_s18 }
  0x2e   :  { %p4321_p5 = scmp.ne.s32.totalorder %s26_s18, %s4320_s14  ;;  %p4326_p7 = scmp.lt.s32.totalorder %s4320_s14, %s4320_s14 }
  0x30   :  { %p4327_p8 = por %p4326_p7, %p4325_p6 }
  0x32   :  { %p4328_p9 = pnand %p4327_p8, %p4321_p5 }
  0x34   :  { %4331 = shalt.err (!%p4328_p9)
}
  0x35   :  { %28 = dma.hbm_to_vmem [thread:$0]  %s4676_s0, 128, %s26_s18, [#allocation3]  }
  0x36   :  { %s4459_s16 = smov [#allocation7]   ;;  %s4460_s19 = smov [#allocation10]  }
  0x37   :  { %s46_s17 = sshll.u32 %s4459_s16, 4  ;;  %s68_s20 = sshll.u32 %s4460_s19, 4  ;;  %s47_s17 = int_to_ptr.vmem [resolvable:$true] %s46_s17  ;;  %s69_s20 = int_to_ptr.vmem [resolvable:$true] %s68_s20 }
  0x38   :  { %s4332_s23 = scalar_lea.hbm %s4678_s2, 36864 }
  0x39   :  { %p4333_p10 = scmp.ne.s32.totalorder %s4678_s2, %s4332_s23  ;;  %p4336_p11 = scmp.lt.u32.totalorder %s4332_s23, %s4678_s2 }
  0x3b   :  { %p4338_p12 = pnand %p4336_p11, %p4333_p10 }
  0x3d   :  { %4341 = shalt.err (!%p4338_p12)
}
  0x3e   :  { %s4342_s0 = scalar_lea.vmem %s47_s17, 36864  ;;  %p4347_p0 = scmp.lt.s32.totalorder %s47_s17, %s47_s17 }
  0x3f   :  { %p4343_p13 = scmp.ne.s32.totalorder %s47_s17, %s4342_s0  ;;  %p4348_p1 = scmp.lt.s32.totalorder %s4342_s0, %s4342_s0 }
  0x41   :  { %p4349_p2 = por %p4348_p1, %p4347_p0 }
  0x43   :  { %p4350_p3 = pnand %p4349_p2, %p4343_p13 }
  0x45   :  { %4353 = shalt.err (!%p4350_p3)
}
  0x46   :  { %52 = dma.hbm_to_vmem [thread:$0]  %s4678_s2, 36864, %s47_s17, [#allocation6], %s4455_s11, %s4455_s11, %s4456_s12  }
  0x47   :  { %s4354_s30 = scalar_lea.hbm %s4680_s4, 6144 }
  0x48   :  { %p4355_p4 = scmp.ne.s32.totalorder %s4680_s4, %s4354_s30  ;;  %p4358_p5 = scmp.lt.u32.totalorder %s4354_s30, %s4680_s4 }
  0x4a   :  { %p4360_p6 = pnand %p4358_p5, %p4355_p4 }
  0x4c   :  { %4363 = shalt.err (!%p4360_p6)
}
  0x4d   :  { %s4364_s14 = scalar_lea.vmem %s69_s20, 6144  ;;  %p4369_p8 = scmp.lt.s32.totalorder %s69_s20, %s69_s20 }
  0x4e   :  { %p4365_p7 = scmp.ne.s32.totalorder %s69_s20, %s4364_s14  ;;  %p4370_p9 = scmp.lt.s32.totalorder %s4364_s14, %s4364_s14 }
  0x50   :  { %p4371_p10 = por %p4370_p9, %p4369_p8 }
  0x52   :  { %p4372_p11 = pnand %p4371_p10, %p4365_p7 }
  0x54   :  { %4375 = shalt.err (!%p4372_p11)
}
  0x55   :  { %s4461_s2 = smov 64   ;;  %s4462_s11 = smov 4  }
  0x56   :  { %74 = dma.hbm_to_vmem [thread:$0]  %s4680_s4, 6144, %s69_s20, [#allocation9], %s4461_s2, %s4461_s2, %s4462_s11  }
  0x57   :  { %s4463_s15 = smov [#allocation11]   ;;  %s4376_s21 = scalar_lea.hbm %s4681_s5, 16 }
  0x58   :  { %s81_s16 = sshll.u32 %s4463_s15, 4  ;;  %p4377_p12 = scmp.ne.s32.totalorder %s4681_s5, %s4376_s21  ;;  %s82_s16 = int_to_ptr.vmem [resolvable:$true] %s81_s16 }
  0x59   :  { %p4380_p13 = scmp.lt.u32.totalorder %s4376_s21, %s4681_s5 }
  0x5b   :  { %p4382_p0 = pnand %p4380_p13, %p4377_p12 }
  0x5d   :  { %4385 = shalt.err (!%p4382_p0)
}
  0x5e   :  { %s4386_s1 = scalar_lea.vmem %s82_s16, 16  ;;  %s4390_s4 = scalar_lea.vmem %s82_s16, 32 }
  0x5f   :  { %p4387_p1 = scmp.ne.s32.totalorder %s82_s16, %s4386_s1  ;;  %p4391_p2 = scmp.lt.s32.totalorder %s82_s16, %s82_s16 }
  0x60   :  { %p4392_p3 = scmp.lt.s32.totalorder %s4390_s4, %s4386_s1 }
  0x62   :  { %p4393_p4 = por %p4392_p3, %p4391_p2 }
  0x64   :  { %p4394_p5 = pnand %p4393_p4, %p4387_p1 }
  0x66   :  { %4397 = shalt.err (!%p4394_p5)
}
  0x67   :  { %84 = dma.hbm_to_vmem [thread:$0]  %s4681_s5, 16, %s82_s16, [#allocation12]  }
  0x68   :  { %4442 = dma.done.wait [#allocation3], 128  }
  0x69   :  { %4443 = vsyncadd [#allocation3], 4294967168 }
  0x6a   :  { %4444 = dma.done.wait [#allocation6], 39936  }
  0x6b   :  { %4445 = vsyncadd [#allocation6], 4294927360 }
  0x6c   :  { %4446 = dma.done.wait [#allocation9], 6240  }
  0x6d   :  { %4447 = vsyncadd [#allocation9], 4294961056 }
  0x6e   :  { %4448 = dma.done.wait [#allocation12], 16  }
  0x6f   :  { %4449 = vsyncadd [#allocation12], 4294967280  ;;  %v4464_v0 = vmov 0   ;;  %v104_v1 = vld [vmem:[#allocation2] sm:$0xff]  ;;  %v3788_v4 = vld [vmem:[#allocation5 + $0x14] ss:$24 sps:$4 sm:$0xff]   ;;  %v122_v20 = vlaneseq }
  0x70   :  { %3784 = vset.pattern.permute.xlu0 %v4464_v0  ;;  %311 = vmatprep.mubr.bf16.mxu1 %v4464_v0  ;;  %v3785_v2 = vld [vmem:[#allocation5 + $0x4] ss:$24 sps:$4 sm:$0xff]   ;;  %v3787_v3 = vld [vmem:[#allocation5] ss:$24 sps:$4 sm:$0xff]   ;;  %v3790_v5 = vld [vmem:[#allocation5 + $0x10] ss:$24 sps:$4 sm:$0xff]  }
  0x71   :  { %393 = vmatprep.mubr.bf16.mxu0 %v4464_v0  ;;  %125 = vperm.xlu0 %3784, %v104_v1   ;;  %v3791_v6 = vld [vmem:[#allocation5 + $0x34] ss:$24 sps:$4 sm:$0xff]   ;;  %v3793_v7 = vld [vmem:[#allocation5 + $0x30] ss:$24 sps:$4 sm:$0xff]   ;;  %v3794_v8 = vld [vmem:[#allocation5 + $0x44] ss:$24 sps:$4 sm:$0xff]  }
  0x72   :  { %279 = vmatprep.subr.bf16.mxu1 %v3785_v2  ;;  %361 = vmatprep.subr.bf16.mxu0 %v3788_v4  ;;  %v3796_v9 = vld [vmem:[#allocation5 + $0x40] ss:$24 sps:$4 sm:$0xff]   ;;  %v3797_v10 = vld [vmem:[#allocation5 + $0x64] ss:$24 sps:$4 sm:$0xff]   ;;  %v3800_v11 = vld [vmem:[#allocation5 + $0x74] ss:$24 sps:$4 sm:$0xff]  }
  0x73   :  { %280 = vmatpush1.bf16.msra.mxu1 %v3787_v3  ;;  %362 = vmatpush1.bf16.msra.mxu0 %v3790_v5  ;;  %v3799_v12 = vld [vmem:[#allocation5 + $0x60] ss:$24 sps:$4 sm:$0xff]   ;;  %v3802_v13 = vld [vmem:[#allocation5 + $0x70] ss:$24 sps:$4 sm:$0xff]   ;;  %v3803_v14 = vld [vmem:[#allocation5 + $0x94] ss:$24 sps:$4 sm:$0xff]  }
  0x74   :  { %281 = vmatprep.subr.bf16.mxu1 %v3791_v6  ;;  %363 = vmatprep.subr.bf16.mxu0 %v3794_v8  ;;  %v3806_v15 = vld [vmem:[#allocation5 + $0xa4] ss:$24 sps:$4 sm:$0xff]   ;;  %v3805_v16 = vld [vmem:[#allocation5 + $0x90] ss:$24 sps:$4 sm:$0xff]   ;;  %v3808_v17 = vld [vmem:[#allocation5 + $0xa0] ss:$24 sps:$4 sm:$0xff]  }
  0x75   :  { %v3811_v18 = vld [vmem:[#allocation5 + $0xc] ss:$24 sps:$4 sm:$0xff]   ;;  %v123_v21 = vand.u32 127, %v122_v20  ;;  %v4465_v23 = vmov 0.0   ;;  %v3809_v25 = vld [vmem:[#allocation5 + $0x8] ss:$24 sps:$4 sm:$0xff]  }
  0x76   :  { %v3823_v19 = vld [vmem:[#allocation7 + $0x4] ss:$24 sps:$4 sm:$0xff]   ;;  %vm275_vm1 = vcmask 523264   ;;  %v3821_v28 = vld [vmem:[#allocation7] ss:$24 sps:$4 sm:$0xff]   ;;  %vm107_vm3 = vcmask 130048  }
  0x77   :  { %282 = vmatpush1.bf16.msra.mxu1 %v3793_v7  ;;  %364 = vmatpush1.bf16.msra.mxu0 %v3796_v9  ;;  %v3814_v27 = vld [vmem:[#allocation5 + $0x3c] ss:$24 sps:$4 sm:$0xff]   ;;  %v3812_v30 = vld [vmem:[#allocation5 + $0x38] ss:$24 sps:$4 sm:$0xff]   ;;  %v3817_v31 = vld [vmem:[#allocation5 + $0x6c] ss:$24 sps:$4 sm:$0xff]  }
  0x78   :  { %283 = vmatprep.subr.bf16.mxu1 %v3797_v10  ;;  %365 = vmatprep.subr.bf16.mxu0 %v3800_v11  ;;  %v3826_v29 = vld [vmem:[#allocation7 + $0x34] ss:$24 sps:$4 sm:$0xff]   ;;  %v3824_v32 = vld [vmem:[#allocation7 + $0x30] ss:$24 sps:$4 sm:$0xff]   ;;  %v3829_v33 = vld [vmem:[#allocation7 + $0x64] ss:$24 sps:$4 sm:$0xff]  }
  0x79   :  { %v3815_v34 = vld [vmem:[#allocation5 + $0x68] ss:$24 sps:$4 sm:$0xff]   ;;  %v3820_v35 = vld [vmem:[#allocation5 + $0x9c] ss:$24 sps:$4 sm:$0xff]   ;;  %v3818_v38 = vld [vmem:[#allocation5 + $0x98] ss:$24 sps:$4 sm:$0xff]  }
  0x7a   :  { %v3827_v36 = vld [vmem:[#allocation7 + $0x60] ss:$24 sps:$4 sm:$0xff]   ;;  %v3832_v37 = vld [vmem:[#allocation7 + $0x94] ss:$24 sps:$4 sm:$0xff]   ;;  %v3830_v39 = vld [vmem:[#allocation7 + $0x90] ss:$24 sps:$4 sm:$0xff]  }
  0x7b   :  { %284 = vmatpush1.bf16.msra.mxu1 %v3799_v12  ;;  %366 = vmatpush1.bf16.msra.mxu0 %v3802_v13  ;;  %v3835_v40 = vld [vmem:[#allocation7 + $0x304] ss:$24 sps:$4 sm:$0xff]   ;;  %v3833_v42 = vld [vmem:[#allocation7 + $0x300] ss:$24 sps:$4 sm:$0xff]   ;;  %v3841_v44 = vld [vmem:[#allocation7 + $0x334] ss:$24 sps:$4 sm:$0xff]  }
  0x7c   :  { %285 = vmatprep.subr.bf16.mxu1 %v3803_v14  ;;  %367 = vmatprep.subr.bf16.mxu0 %v3806_v15  ;;  %v3838_v41 = vld [vmem:[#allocation7 + $0xc4] ss:$24 sps:$4 sm:$0xff]   ;;  %v3836_v43 = vld [vmem:[#allocation7 + $0xc0] ss:$24 sps:$4 sm:$0xff]   ;;  %v3844_v45 = vld [vmem:[#allocation7 + $0xf4] ss:$24 sps:$4 sm:$0xff]  }
  0x7d   :  { %v3839_v46 = vld [vmem:[#allocation7 + $0x330] ss:$24 sps:$4 sm:$0xff]   ;;  %v3847_v48 = vld [vmem:[#allocation7 + $0x364] ss:$24 sps:$4 sm:$0xff]   ;;  %v3845_v50 = vld [vmem:[#allocation7 + $0x360] ss:$24 sps:$4 sm:$0xff]  }
  0x7e   :  { %v3842_v47 = vld [vmem:[#allocation7 + $0xf0] ss:$24 sps:$4 sm:$0xff]   ;;  %v3850_v49 = vld [vmem:[#allocation7 + $0x124] ss:$24 sps:$4 sm:$0xff]   ;;  %v3848_v51 = vld [vmem:[#allocation7 + $0x120] ss:$24 sps:$4 sm:$0xff]  }
  0x7f   :  { %286 = vmatpush1.bf16.msra.mxu1 %v3805_v16  ;;  %368 = vmatpush1.bf16.msra.mxu0 %v3808_v17  ;;  %v3853_v52 = vld [vmem:[#allocation7 + $0x394] ss:$24 sps:$4 sm:$0xff]   ;;  %v3851_v54 = vld [vmem:[#allocation7 + $0x390] ss:$24 sps:$4 sm:$0xff]   ;;  %v3859_v56 = vld [vmem:[#allocation7 + $0x3c4] ss:$24 sps:$4 sm:$0xff]  }
  0x80   :  { %320 = vmatprep.subr.bf16.mxu1 %v3811_v18  ;;  %2168 = vmatprep.subr.bf16.mxu0 %v3823_v19  ;;  %v3856_v53 = vld [vmem:[#allocation7 + $0x154] ss:$24 sps:$4 sm:$0xff]   ;;  %v3854_v55 = vld [vmem:[#allocation7 + $0x150] ss:$24 sps:$4 sm:$0xff]   ;;  %v3862_v57 = vld [vmem:[#allocation7 + $0x184] ss:$24 sps:$4 sm:$0xff]  }
  0x81   :  { %v3857_v58 = vld [vmem:[#allocation7 + $0x3c0] ss:$24 sps:$4 sm:$0xff]   ;;  %v3865_v60 = vld [vmem:[#allocation7 + $0x3f4] ss:$24 sps:$4 sm:$0xff]   ;;  %v3863_v62 = vld [vmem:[#allocation7 + $0x3f0] ss:$24 sps:$4 sm:$0xff]  }
  0x82   :  { %v3860_v59 = vld [vmem:[#allocation7 + $0x180] ss:$24 sps:$4 sm:$0xff]   ;;  %v3868_v61 = vld [vmem:[#allocation7 + $0x1b4] ss:$24 sps:$4 sm:$0xff]   ;;  %v3866_v63 = vld [vmem:[#allocation7 + $0x1b0] ss:$24 sps:$4 sm:$0xff]  }
  0x83   :  { %v3871_v1 = vld [vmem:[#allocation7 + $0x424] ss:$24 sps:$4 sm:$0xff]   ;;  %v3869_v3 = vld [vmem:[#allocation7 + $0x420] ss:$24 sps:$4 sm:$0xff]   ;;  %v3877_v5 = vld [vmem:[#allocation7 + $0x454] ss:$24 sps:$4 sm:$0xff]  }
  0x84   :  { %v3874_v2 = vld [vmem:[#allocation7 + $0x1e4] ss:$24 sps:$4 sm:$0xff]   ;;  %v3872_v4 = vld [vmem:[#allocation7 + $0x1e0] ss:$24 sps:$4 sm:$0xff]   ;;  %v3880_v6 = vld [vmem:[#allocation7 + $0x214] ss:$24 sps:$4 sm:$0xff]  }
  0x85   :  { %v3875_v7 = vld [vmem:[#allocation7 + $0x450] ss:$24 sps:$4 sm:$0xff]   ;;  %v3883_v9 = vld [vmem:[#allocation7 + $0x484] ss:$24 sps:$4 sm:$0xff]   ;;  %v3881_v11 = vld [vmem:[#allocation7 + $0x480] ss:$24 sps:$4 sm:$0xff]  }
  0x86   :  { %v3878_v8 = vld [vmem:[#allocation7 + $0x210] ss:$24 sps:$4 sm:$0xff]   ;;  %v3886_v10 = vld [vmem:[#allocation7 + $0x244] ss:$24 sps:$4 sm:$0xff]   ;;  %v3884_v12 = vld [vmem:[#allocation7 + $0x240] ss:$24 sps:$4 sm:$0xff]  }
  0x87   :  { %v3889_v13 = vld [vmem:[#allocation7 + $0x4b4] ss:$24 sps:$4 sm:$0xff]   ;;  %v3887_v15 = vld [vmem:[#allocation7 + $0x4b0] ss:$24 sps:$4 sm:$0xff]   ;;  %v3895_v17 = vld [vmem:[#allocation7 + $0x4e4] ss:$24 sps:$4 sm:$0xff]  }
  0x88   :  { %v3892_v14 = vld [vmem:[#allocation7 + $0x274] ss:$24 sps:$4 sm:$0xff]   ;;  %v3890_v16 = vld [vmem:[#allocation7 + $0x270] ss:$24 sps:$4 sm:$0xff]   ;;  %v3898_v18 = vld [vmem:[#allocation7 + $0x2a4] ss:$24 sps:$4 sm:$0xff]  }
  0x89   :  { %v3893_v19 = vld [vmem:[#allocation7 + $0x4e0] ss:$24 sps:$4 sm:$0xff]   ;;  %s4466_s5 = smov [#allocation14]  }
  0x8a   :  { %s2969_s0 = sshll.u32 %s4466_s5, 4  ;;  %s2970_s0 = int_to_ptr.vmem [resolvable:$true] %s2969_s0 }
  0x8b   :  { %s4398_s18 = scalar_lea.vmem %s2970_s0, 128  ;;  %p4403_p7 = scmp.lt.s32.totalorder %s2970_s0, %s2970_s0 }
  0x8c   :  { %p4399_p6 = scmp.ne.s32.totalorder %s2970_s0, %s4398_s18  ;;  %p4404_p8 = scmp.lt.s32.totalorder %s4398_s18, %s4398_s18 }
  0x8e   :  { %p4405_p9 = por %p4404_p8, %p4403_p7 }
  0x90   :  { %p4406_p10 = pnand %p4405_p9, %p4399_p6 }
  0xf0   :  { %v126_v22 = vpop.permute.xlu0 %125 }
  0xf1   :  { %vm127_vm0 = vcmp.eq.s32.totalorder %v123_v21, %v126_v22  ;;  %v3896_v21 = vld [vmem:[#allocation7 + $0x2a0] ss:$24 sps:$4 sm:$0xff]   ;;  %v3901_v22 = vld [vmem:[#allocation7 + $0x514] ss:$24 sps:$4 sm:$0xff]  }
  0xf2   :  { %v2985_v24 = vsel %vm127_vm0, 1.0, %v4465_v23  ;;  %v3899_v23 = vld [vmem:[#allocation7 + $0x510] ss:$24 sps:$4 sm:$0xff]  }
  0xf3   :  { %v130_v26 = vpack.c.bf16 %v2985_v24, %v2985_v24  ;;  %v3904_v24 = vld [vmem:[#allocation7 + $0x2d4] ss:$24 sps:$4 sm:$0xff]  }
  0xf5   :  { %3010 = vmatmul.mubr.msk.bf16.vlgmr.msra.gmra.mrb[0].mxu1 %vm275_vm1, %v130_v26  ;;  %3012 = vmatmul.mubr.msk.bf16.vlgmr.msra.gmra.mrb[0].mxu0 %vm275_vm1, %v130_v26 }
  0xf6   :  { %321 = vmatpush1.bf16.msra.mxu1 %v3809_v25  ;;  %352 = vmatprep.mubr.bf16.mxu1 %v4464_v0  ;;  %v3902_v25 = vld [vmem:[#allocation7 + $0x2d0] ss:$24 sps:$4 sm:$0xff]  }
  0xf7   :  { %322 = vmatprep.subr.bf16.mxu1 %v3814_v27  ;;  %2169 = vmatpush1.bf16.msra.mxu0 %v3821_v28  ;;  %v3905_v27 = vld [vmem:[#allocation7 + $0x540] ss:$24 sps:$4 sm:$0xff]   ;;  %v3910_v28 = vld [vmem:[#allocation7 + $0xc] ss:$24 sps:$4 sm:$0xff]  }
  0xf8   :  { %2170 = vmatprep.subr.bf16.mxu0 %v3826_v29  ;;  %v3911_v29 = vld [vmem:[#allocation7 + $0x570] ss:$24 sps:$4 sm:$0xff]  }
  0xfa   :  { %323 = vmatpush1.bf16.msra.mxu1 %v3812_v30  ;;  %v3913_v30 = vld [vmem:[#allocation7 + $0x574] ss:$24 sps:$4 sm:$0xff]  }
  0xfb   :  { %324 = vmatprep.subr.bf16.mxu1 %v3817_v31  ;;  %2171 = vmatpush1.bf16.msra.mxu0 %v3824_v32  ;;  %v3917_v31 = vld [vmem:[#allocation7 + $0x5a0] ss:$24 sps:$4 sm:$0xff]   ;;  %v3919_v32 = vld [vmem:[#allocation7 + $0x5a4] ss:$24 sps:$4 sm:$0xff]  }
  0xfc   :  { %2172 = vmatprep.subr.bf16.mxu0 %v3829_v33  ;;  %v3925_v33 = vld [vmem:[#allocation7 + $0x5d4] ss:$24 sps:$4 sm:$0xff]  }
  0xfe   :  { %325 = vmatpush1.bf16.msra.mxu1 %v3815_v34  ;;  %v3923_v34 = vld [vmem:[#allocation7 + $0x5d0] ss:$24 sps:$4 sm:$0xff]  }
  0xff   :  { %326 = vmatprep.subr.bf16.mxu1 %v3820_v35  ;;  %2173 = vmatpush1.bf16.msra.mxu0 %v3827_v36  ;;  %v3931_v35 = vld [vmem:[#allocation7 + $0x604] ss:$24 sps:$4 sm:$0xff]  }
 0x100   :  { %2174 = vmatprep.subr.bf16.mxu0 %v3832_v37 }
 0x102   :  { %327 = vmatpush1.bf16.msra.mxu1 %v3818_v38 }
 0x103   :  { %2175 = vmatpush1.bf16.msra.mxu0 %v3830_v39  ;;  %2209 = vmatprep.subr.bf16.mxu1 %v3835_v40 }
 0x104   :  { %2176 = vmatprep.subr.bf16.mxu0 %v3838_v41 }
 0x105   :  { %3011 = vmatmul.mubr.msk.bf16.vlgmr.msra.gmra.mrb[4].mxu1 %vm275_vm1, %v130_v26  ;;  %v3907_v26 = vld [vmem:[#allocation7 + $0x544] ss:$24 sps:$4 sm:$0xff]  }
 0x106   :  { %2210 = vmatpush1.bf16.msra.mxu1 %v3833_v42 }
 0x107   :  { %2177 = vmatpush1.bf16.msra.mxu0 %v3836_v43  ;;  %2211 = vmatprep.subr.bf16.mxu1 %v3841_v44  ;;  %v3908_v43 = vld [vmem:[#allocation7 + $0x8] ss:$24 sps:$4 sm:$0xff]  }
 0x108   :  { %2178 = vmatprep.subr.bf16.mxu0 %v3844_v45 }
 0x10a   :  { %2212 = vmatpush1.bf16.msra.mxu1 %v3839_v46 }
 0x10b   :  { %2179 = vmatpush1.bf16.msra.mxu0 %v3842_v47  ;;  %2213 = vmatprep.subr.bf16.mxu1 %v3847_v48  ;;  %v3916_v47 = vld [vmem:[#allocation7 + $0x3c] ss:$24 sps:$4 sm:$0xff]   ;;  %v3914_v48 = vld [vmem:[#allocation7 + $0x38] ss:$24 sps:$4 sm:$0xff]  }
 0x10c   :  { %2180 = vmatprep.subr.bf16.mxu0 %v3850_v49  ;;  %v3922_v49 = vld [vmem:[#allocation7 + $0x6c] ss:$24 sps:$4 sm:$0xff]  }
 0x10e   :  { %2214 = vmatpush1.bf16.msra.mxu1 %v3845_v50  ;;  %v3920_v50 = vld [vmem:[#allocation7 + $0x68] ss:$24 sps:$4 sm:$0xff]  }
 0x10f   :  { %2181 = vmatpush1.bf16.msra.mxu0 %v3848_v51  ;;  %2215 = vmatprep.subr.bf16.mxu1 %v3853_v52  ;;  %v3928_v51 = vld [vmem:[#allocation7 + $0x9c] ss:$24 sps:$4 sm:$0xff]   ;;  %v3926_v52 = vld [vmem:[#allocation7 + $0x98] ss:$24 sps:$4 sm:$0xff]  }
 0x110   :  { %2182 = vmatprep.subr.bf16.mxu0 %v3856_v53  ;;  %v3934_v53 = vld [vmem:[#allocation7 + $0xcc] ss:$24 sps:$4 sm:$0xff]  }
 0x112   :  { %2216 = vmatpush1.bf16.msra.mxu1 %v3851_v54 }
 0x113   :  { %2183 = vmatpush1.bf16.msra.mxu0 %v3854_v55  ;;  %2217 = vmatprep.subr.bf16.mxu1 %v3859_v56 }
 0x114   :  { %2184 = vmatprep.subr.bf16.mxu0 %v3862_v57 }
 0x116   :  { %2218 = vmatpush1.bf16.msra.mxu1 %v3857_v58  ;;  %v3929_v58 = vld [vmem:[#allocation7 + $0x600] ss:$24 sps:$4 sm:$0xff]  }
 0x117   :  { %2185 = vmatpush1.bf16.msra.mxu0 %v3860_v59  ;;  %2219 = vmatprep.subr.bf16.mxu1 %v3865_v60 }
 0x118   :  { %2186 = vmatprep.subr.bf16.mxu0 %v3868_v61  ;;  %v3932_v61 = vld [vmem:[#allocation7 + $0xc8] ss:$24 sps:$4 sm:$0xff]  }
 0x11a   :  { %2220 = vmatpush1.bf16.msra.mxu1 %v3863_v62  ;;  %v3937_v62 = vld [vmem:[#allocation7 + $0x634] ss:$24 sps:$4 sm:$0xff]  }
 0x11b   :  { %2187 = vmatpush1.bf16.msra.mxu0 %v3866_v63  ;;  %2221 = vmatprep.subr.bf16.mxu1 %v3871_v1  ;;  %v3940_v1 = vld [vmem:[#allocation7 + $0xfc] ss:$24 sps:$4 sm:$0xff]  }
 0x11c   :  { %2188 = vmatprep.subr.bf16.mxu0 %v3874_v2  ;;  %v3935_v2 = vld [vmem:[#allocation7 + $0x630] ss:$24 sps:$4 sm:$0xff]  }
 0x11e   :  { %2222 = vmatpush1.bf16.msra.mxu1 %v3869_v3  ;;  %v3938_v3 = vld [vmem:[#allocation7 + $0xf8] ss:$24 sps:$4 sm:$0xff]  }
 0x11f   :  { %2189 = vmatpush1.bf16.msra.mxu0 %v3872_v4  ;;  %2223 = vmatprep.subr.bf16.mxu1 %v3877_v5  ;;  %v3943_v4 = vld [vmem:[#allocation7 + $0x664] ss:$24 sps:$4 sm:$0xff]  }
 0x120   :  { %2190 = vmatprep.subr.bf16.mxu0 %v3880_v6  ;;  %v3946_v5 = vld [vmem:[#allocation7 + $0x12c] ss:$24 sps:$4 sm:$0xff]   ;;  %v3941_v6 = vld [vmem:[#allocation7 + $0x660] ss:$24 sps:$4 sm:$0xff]  }
 0x122   :  { %2224 = vmatpush1.bf16.msra.mxu1 %v3875_v7  ;;  %v3944_v7 = vld [vmem:[#allocation7 + $0x128] ss:$24 sps:$4 sm:$0xff]  }
 0x123   :  { %2191 = vmatpush1.bf16.msra.mxu0 %v3878_v8  ;;  %2225 = vmatprep.subr.bf16.mxu1 %v3883_v9  ;;  %v3949_v8 = vld [vmem:[#allocation7 + $0x694] ss:$24 sps:$4 sm:$0xff]  }
 0x124   :  { %2192 = vmatprep.subr.bf16.mxu0 %v3886_v10  ;;  %v3952_v9 = vld [vmem:[#allocation7 + $0x15c] ss:$24 sps:$4 sm:$0xff]   ;;  %v3947_v10 = vld [vmem:[#allocation7 + $0x690] ss:$24 sps:$4 sm:$0xff]  }
 0x126   :  { %2226 = vmatpush1.bf16.msra.mxu1 %v3881_v11  ;;  %v3950_v11 = vld [vmem:[#allocation7 + $0x158] ss:$24 sps:$4 sm:$0xff]  }
 0x127   :  { %2193 = vmatpush1.bf16.msra.mxu0 %v3884_v12  ;;  %2227 = vmatprep.subr.bf16.mxu1 %v3889_v13  ;;  %v3955_v12 = vld [vmem:[#allocation7 + $0x6c4] ss:$24 sps:$4 sm:$0xff]  }
 0x128   :  { %2194 = vmatprep.subr.bf16.mxu0 %v3892_v14  ;;  %v3958_v13 = vld [vmem:[#allocation7 + $0x18c] ss:$24 sps:$4 sm:$0xff]   ;;  %v3953_v14 = vld [vmem:[#allocation7 + $0x6c0] ss:$24 sps:$4 sm:$0xff]  }
 0x12a   :  { %2228 = vmatpush1.bf16.msra.mxu1 %v3887_v15  ;;  %v3956_v15 = vld [vmem:[#allocation7 + $0x188] ss:$24 sps:$4 sm:$0xff]  }
 0x12b   :  { %2195 = vmatpush1.bf16.msra.mxu0 %v3890_v16  ;;  %2229 = vmatprep.subr.bf16.mxu1 %v3895_v17  ;;  %v3961_v16 = vld [vmem:[#allocation7 + $0x6f4] ss:$24 sps:$4 sm:$0xff]  }
 0x12c   :  { %2196 = vmatprep.subr.bf16.mxu0 %v3898_v18  ;;  %v3964_v17 = vld [vmem:[#allocation7 + $0x1bc] ss:$24 sps:$4 sm:$0xff]   ;;  %v3959_v18 = vld [vmem:[#allocation7 + $0x6f0] ss:$24 sps:$4 sm:$0xff]  }
 0x12e   :  { %2230 = vmatpush1.bf16.msra.mxu1 %v3893_v19  ;;  %v3962_v19 = vld [vmem:[#allocation7 + $0x1b8] ss:$24 sps:$4 sm:$0xff]  }
 0x12f   :  { %2197 = vmatpush1.bf16.msra.mxu0 %v3896_v21  ;;  %2231 = vmatprep.subr.bf16.mxu1 %v3901_v22  ;;  %v3967_v21 = vld [vmem:[#allocation7 + $0x724] ss:$24 sps:$4 sm:$0xff]  }
 0x130   :  { %2198 = vmatprep.subr.bf16.mxu0 %v3904_v24  ;;  %v3970_v22 = vld [vmem:[#allocation7 + $0x1ec] ss:$24 sps:$4 sm:$0xff]   ;;  %v3968_v24 = vld [vmem:[#allocation7 + $0x1e8] ss:$24 sps:$4 sm:$0xff]  }
 0x132   :  { %2232 = vmatpush1.bf16.msra.mxu1 %v3899_v23  ;;  %v3965_v23 = vld [vmem:[#allocation7 + $0x720] ss:$24 sps:$4 sm:$0xff]  }
 0x133   :  { %2199 = vmatpush1.bf16.msra.mxu0 %v3902_v25  ;;  %2233 = vmatprep.subr.bf16.mxu1 %v3907_v26  ;;  %v3973_v25 = vld [vmem:[#allocation7 + $0x754] ss:$24 sps:$4 sm:$0xff]  }
 0x134   :  { %2291 = vmatprep.subr.bf16.mxu0 %v3910_v28  ;;  %v3976_v26 = vld [vmem:[#allocation7 + $0x21c] ss:$24 sps:$4 sm:$0xff]   ;;  %v3974_v28 = vld [vmem:[#allocation7 + $0x218] ss:$24 sps:$4 sm:$0xff]  }
 0x136   :  { %2234 = vmatpush1.bf16.msra.mxu1 %v3905_v27  ;;  %v3971_v27 = vld [vmem:[#allocation7 + $0x750] ss:$24 sps:$4 sm:$0xff]  }
 0x137   :  { %2235 = vmatprep.subr.bf16.mxu1 %v3913_v30  ;;  %v3982_v30 = vld [vmem:[#allocation7 + $0x24c] ss:$24 sps:$4 sm:$0xff]  }
 0x13a   :  { %2236 = vmatpush1.bf16.msra.mxu1 %v3911_v29  ;;  %v3979_v29 = vld [vmem:[#allocation7 + $0x784] ss:$24 sps:$4 sm:$0xff]  }
 0x13b   :  { %2237 = vmatprep.subr.bf16.mxu1 %v3919_v32  ;;  %v3980_v32 = vld [vmem:[#allocation7 + $0x248] ss:$24 sps:$4 sm:$0xff]  }
 0x13e   :  { %2238 = vmatpush1.bf16.msra.mxu1 %v3917_v31  ;;  %v3977_v31 = vld [vmem:[#allocation7 + $0x780] ss:$24 sps:$4 sm:$0xff]  }
 0x13f   :  { %2239 = vmatprep.subr.bf16.mxu1 %v3925_v33  ;;  %v3985_v33 = vld [vmem:[#allocation7 + $0x7b4] ss:$24 sps:$4 sm:$0xff]  }
 0x142   :  { %2240 = vmatpush1.bf16.msra.mxu1 %v3923_v34  ;;  %v3988_v34 = vld [vmem:[#allocation7 + $0x27c] ss:$24 sps:$4 sm:$0xff]  }
 0x143   :  { %2250 = vmatprep.subr.bf16.mxu1 %v3931_v35  ;;  %v3983_v35 = vld [vmem:[#allocation7 + $0x7b0] ss:$24 sps:$4 sm:$0xff]  }
 0x1c8   :  { %v313_v36 = vpop.f32.mrb[0].mxu1  ;;  %v4594_v37 = vpop.f32.mrb[0].mxu0 }
 0x1c9   :  { %v315_v38 = vpop.f32.mrb[1].mxu1  ;;  %v397_v39 = vpop.f32.mrb[1].mxu0  ;;  %v4598_v44 = vpack.c.bf16 %v313_v36, %v313_v36  ;;  %v3986_v36 = vld [vmem:[#allocation7 + $0x278] ss:$24 sps:$4 sm:$0xff]  }
 0x1ca   :  { %v4596_v40 = vpack.c.bf16 %v315_v38, %v315_v38  ;;  %v317_v41 = vpop.f32.mrb[2].mxu1  ;;  %v399_v42 = vpop.f32.mrb[2].mxu0  ;;  %v4607_v63 = vpack.c.bf16 %v397_v39, %v397_v39  ;;  %v3991_v38 = vld [vmem:[#allocation7 + $0x7e4] ss:$24 sps:$4 sm:$0xff]  }
 0x1cb   :  { %v318_v45 = vpop.f32.mrb[3].mxu1  ;;  %v400_v46 = vpop.f32.mrb[3].mxu0  ;;  %v3994_v39 = vld [vmem:[#allocation7 + $0x2ac] ss:$24 sps:$4 sm:$0xff]   ;;  %v3989_v41 = vld [vmem:[#allocation7 + $0x7e0] ss:$24 sps:$4 sm:$0xff]  }
 0x1cc   :  { %2200 = vmatprep.mubr.bf16.mxu0 %v4596_v40  ;;  %v3992_v42 = vld [vmem:[#allocation7 + $0x2a8] ss:$24 sps:$4 sm:$0xff]   ;;  %v4000_v45 = vld [vmem:[#allocation7 + $0x2dc] ss:$24 sps:$4 sm:$0xff]  }
 0x1cd   :  { %2201 = vmatmul.mubr.bf16.vlgmr.msra.gmra.mrb[4].mxu0 %v4598_v44  ;;  %v3995_v46 = vld [vmem:[#allocation7 + $0x810] ss:$24 sps:$4 sm:$0xff]  }
 0x1ce   :  { %2292 = vmatpush1.bf16.msra.mxu0 %v3908_v43  ;;  %2323 = vmatprep.mubr.bf16.mxu0 %v4596_v40  ;;  %v3997_v43 = vld [vmem:[#allocation7 + $0x814] ss:$24 sps:$4 sm:$0xff]  }
 0x1cf   :  { %2293 = vmatprep.subr.bf16.mxu0 %v3916_v47  ;;  %v3998_v47 = vld [vmem:[#allocation7 + $0x2d8] ss:$24 sps:$4 sm:$0xff]  }
 0x1d2   :  { %2294 = vmatpush1.bf16.msra.mxu0 %v3914_v48  ;;  %v4003_v48 = vld [vmem:[#allocation7 + $0x844] ss:$24 sps:$4 sm:$0xff]  }
 0x1d3   :  { %2295 = vmatprep.subr.bf16.mxu0 %v3922_v49  ;;  %v4006_v49 = vld [vmem:[#allocation7 + $0x30c] ss:$24 sps:$4 sm:$0xff]  }
 0x1d6   :  { %2296 = vmatpush1.bf16.msra.mxu0 %v3920_v50  ;;  %v4001_v50 = vld [vmem:[#allocation7 + $0x840] ss:$24 sps:$4 sm:$0xff]  }
 0x1d7   :  { %2297 = vmatprep.subr.bf16.mxu0 %v3928_v51  ;;  %v4004_v51 = vld [vmem:[#allocation7 + $0x308] ss:$24 sps:$4 sm:$0xff]  }
 0x1d8   :  { %v354_v54 = vpop.f32.mrb[4].mxu1 }
 0x1d9   :  { %v356_v55 = vpop.f32.mrb[5].mxu1  ;;  %v4605_v59 = vpack.c.bf16 %v354_v54, %v354_v54  ;;  %v4007_v54 = vld [vmem:[#allocation7 + $0x870] ss:$24 sps:$4 sm:$0xff]  }
 0x1da   :  { %v4603_v56 = vpack.c.bf16 %v356_v55, %v356_v55  ;;  %v358_v57 = vpop.f32.mrb[6].mxu1  ;;  %2298 = vmatpush1.bf16.msra.mxu0 %v3926_v52  ;;  %v4009_v52 = vld [vmem:[#allocation7 + $0x874] ss:$24 sps:$4 sm:$0xff]   ;;  %v4010_v55 = vld [vmem:[#allocation7 + $0x338] ss:$24 sps:$4 sm:$0xff]  }
 0x1db   :  { %v359_v60 = vpop.f32.mrb[7].mxu1  ;;  %2299 = vmatprep.subr.bf16.mxu0 %v3934_v53  ;;  %v4012_v53 = vld [vmem:[#allocation7 + $0x33c] ss:$24 sps:$4 sm:$0xff]  }
 0x1dc   :  { %2241 = vmatprep.mubr.bf16.mxu1 %v4603_v56  ;;  %v4015_v57 = vld [vmem:[#allocation7 + $0x8a4] ss:$24 sps:$4 sm:$0xff]   ;;  %v4013_v60 = vld [vmem:[#allocation7 + $0x8a0] ss:$24 sps:$4 sm:$0xff]  }
 0x1dd   :  { %2242 = vmatmul.mubr.bf16.vlgmr.msra.gmra.mrb[8].mxu1 %v4605_v59 }
 0x1de   :  { %2251 = vmatpush1.bf16.msra.mxu1 %v3929_v58  ;;  %2282 = vmatprep.mubr.bf16.mxu1 %v4607_v63  ;;  %v4018_v58 = vld [vmem:[#allocation7 + $0x36c] ss:$24 sps:$4 sm:$0xff]  }
 0x1df   :  { %2300 = vmatpush1.bf16.msra.mxu0 %v3932_v61  ;;  %2252 = vmatprep.subr.bf16.mxu1 %v3937_v62  ;;  %v4016_v61 = vld [vmem:[#allocation7 + $0x368] ss:$24 sps:$4 sm:$0xff]   ;;  %v4021_v62 = vld [vmem:[#allocation7 + $0x8d4] ss:$24 sps:$4 sm:$0xff]  }
 0x1e0   :  { %2301 = vmatprep.subr.bf16.mxu0 %v3940_v1  ;;  %v4024_v1 = vld [vmem:[#allocation7 + $0x39c] ss:$24 sps:$4 sm:$0xff]  }
 0x1e2   :  { %2253 = vmatpush1.bf16.msra.mxu1 %v3935_v2  ;;  %v4019_v2 = vld [vmem:[#allocation7 + $0x8d0] ss:$24 sps:$4 sm:$0xff]  }
 0x1e3   :  { %2302 = vmatpush1.bf16.msra.mxu0 %v3938_v3  ;;  %2254 = vmatprep.subr.bf16.mxu1 %v3943_v4  ;;  %v4022_v3 = vld [vmem:[#allocation7 + $0x398] ss:$24 sps:$4 sm:$0xff]   ;;  %v4027_v4 = vld [vmem:[#allocation7 + $0x14] ss:$24 sps:$4 sm:$0xff]  }
 0x1e4   :  { %2303 = vmatprep.subr.bf16.mxu0 %v3946_v5  ;;  %v4030_v5 = vld [vmem:[#allocation7 + $0x3cc] ss:$24 sps:$4 sm:$0xff]  }
 0x1e6   :  { %2255 = vmatpush1.bf16.msra.mxu1 %v3941_v6  ;;  %v4025_v6 = vld [vmem:[#allocation7 + $0x10] ss:$24 sps:$4 sm:$0xff]  }
 0x1e7   :  { %2304 = vmatpush1.bf16.msra.mxu0 %v3944_v7  ;;  %2256 = vmatprep.subr.bf16.mxu1 %v3949_v8  ;;  %v4616_v7 = vpack.c.bf16 %v4594_v37, %v4594_v37  ;;  %v4028_v8 = vld [vmem:[#allocation7 + $0x3c8] ss:$24 sps:$4 sm:$0xff]  }
 0x1e8   :  { %2305 = vmatprep.subr.bf16.mxu0 %v3952_v9  ;;  %v4033_v9 = vld [vmem:[#allocation7 + $0x44] ss:$24 sps:$4 sm:$0xff]   ;;  %v4037_v37 = vld [vmem:[#allocation7 + $0x70] ss:$24 sps:$4 sm:$0xff]  }
 0x1ea   :  { %2257 = vmatpush1.bf16.msra.mxu1 %v3947_v10  ;;  %v4036_v10 = vld [vmem:[#allocation7 + $0x3fc] ss:$24 sps:$4 sm:$0xff]  }
 0x1eb   :  { %2306 = vmatpush1.bf16.msra.mxu0 %v3950_v11  ;;  %2258 = vmatprep.subr.bf16.mxu1 %v3955_v12  ;;  %v4031_v11 = vld [vmem:[#allocation7 + $0x40] ss:$24 sps:$4 sm:$0xff]  }
 0x1ec   :  { %2307 = vmatprep.subr.bf16.mxu0 %v3958_v13  ;;  %v4034_v12 = vld [vmem:[#allocation7 + $0x3f8] ss:$24 sps:$4 sm:$0xff]   ;;  %v4039_v13 = vld [vmem:[#allocation7 + $0x74] ss:$24 sps:$4 sm:$0xff]  }
 0x1ee   :  { %2259 = vmatpush1.bf16.msra.mxu1 %v3953_v14  ;;  %v4042_v14 = vld [vmem:[#allocation7 + $0x42c] ss:$24 sps:$4 sm:$0xff]  }
 0x1ef   :  { %2308 = vmatpush1.bf16.msra.mxu0 %v3956_v15  ;;  %2260 = vmatprep.subr.bf16.mxu1 %v3961_v16  ;;  %v4040_v15 = vld [vmem:[#allocation7 + $0x428] ss:$24 sps:$4 sm:$0xff]   ;;  %v4045_v16 = vld [vmem:[#allocation7 + $0xa4] ss:$24 sps:$4 sm:$0xff]  }
 0x1f0   :  { %2309 = vmatprep.subr.bf16.mxu0 %v3964_v17  ;;  %v4048_v17 = vld [vmem:[#allocation7 + $0x45c] ss:$24 sps:$4 sm:$0xff]  }
 0x1f2   :  { %2261 = vmatpush1.bf16.msra.mxu1 %v3959_v18  ;;  %v4043_v18 = vld [vmem:[#allocation7 + $0xa0] ss:$24 sps:$4 sm:$0xff]  }
 0x1f3   :  { %2310 = vmatpush1.bf16.msra.mxu0 %v3962_v19  ;;  %2262 = vmatprep.subr.bf16.mxu1 %v3967_v21  ;;  %v4051_v19 = vld [vmem:[#allocation7 + $0xd4] ss:$24 sps:$4 sm:$0xff]  }
 0x1f4   :  { %2311 = vmatprep.subr.bf16.mxu0 %v3970_v22  ;;  %v4054_v21 = vld [vmem:[#allocation7 + $0x48c] ss:$24 sps:$4 sm:$0xff]   ;;  %v4049_v22 = vld [vmem:[#allocation7 + $0xd0] ss:$24 sps:$4 sm:$0xff]  }
 0x1f6   :  { %2263 = vmatpush1.bf16.msra.mxu1 %v3965_v23  ;;  %v4052_v23 = vld [vmem:[#allocation7 + $0x488] ss:$24 sps:$4 sm:$0xff]  }
 0x1f7   :  { %2312 = vmatpush1.bf16.msra.mxu0 %v3968_v24  ;;  %2264 = vmatprep.subr.bf16.mxu1 %v3973_v25  ;;  %v4057_v24 = vld [vmem:[#allocation7 + $0x104] ss:$24 sps:$4 sm:$0xff]  }
 0x1f8   :  { %2313 = vmatprep.subr.bf16.mxu0 %v3976_v26  ;;  %v4060_v25 = vld [vmem:[#allocation7 + $0x4bc] ss:$24 sps:$4 sm:$0xff]   ;;  %v4055_v26 = vld [vmem:[#allocation7 + $0x100] ss:$24 sps:$4 sm:$0xff]  }
 0x1fa   :  { %2265 = vmatpush1.bf16.msra.mxu1 %v3971_v27  ;;  %v4058_v27 = vld [vmem:[#allocation7 + $0x4b8] ss:$24 sps:$4 sm:$0xff]  }
 0x1fb   :  { %2314 = vmatpush1.bf16.msra.mxu0 %v3974_v28  ;;  %2266 = vmatprep.subr.bf16.mxu1 %v3979_v29  ;;  %v4063_v28 = vld [vmem:[#allocation7 + $0x134] ss:$24 sps:$4 sm:$0xff]  }
 0x1fc   :  { %2315 = vmatprep.subr.bf16.mxu0 %v3982_v30  ;;  %v4066_v29 = vld [vmem:[#allocation7 + $0x4ec] ss:$24 sps:$4 sm:$0xff]   ;;  %v4061_v30 = vld [vmem:[#allocation7 + $0x130] ss:$24 sps:$4 sm:$0xff]  }
 0x1fe   :  { %2267 = vmatpush1.bf16.msra.mxu1 %v3977_v31  ;;  %v4064_v31 = vld [vmem:[#allocation7 + $0x4e8] ss:$24 sps:$4 sm:$0xff]  }
 0x1ff   :  { %2316 = vmatpush1.bf16.msra.mxu0 %v3980_v32  ;;  %2268 = vmatprep.subr.bf16.mxu1 %v3985_v33  ;;  %v4069_v32 = vld [vmem:[#allocation7 + $0x164] ss:$24 sps:$4 sm:$0xff]  }
 0x200   :  { %2317 = vmatprep.subr.bf16.mxu0 %v3988_v34  ;;  %v4072_v33 = vld [vmem:[#allocation7 + $0x51c] ss:$24 sps:$4 sm:$0xff]   ;;  %v4067_v34 = vld [vmem:[#allocation7 + $0x160] ss:$24 sps:$4 sm:$0xff]  }
 0x202   :  { %2269 = vmatpush1.bf16.msra.mxu1 %v3983_v35  ;;  %v4070_v35 = vld [vmem:[#allocation7 + $0x518] ss:$24 sps:$4 sm:$0xff]  }
 0x203   :  { %2318 = vmatpush1.bf16.msra.mxu0 %v3986_v36  ;;  %2270 = vmatprep.subr.bf16.mxu1 %v3991_v38  ;;  %v4075_v36 = vld [vmem:[#allocation7 + $0x194] ss:$24 sps:$4 sm:$0xff]  }
 0x204   :  { %2319 = vmatprep.subr.bf16.mxu0 %v3994_v39  ;;  %v4078_v38 = vld [vmem:[#allocation7 + $0x54c] ss:$24 sps:$4 sm:$0xff]   ;;  %v4073_v39 = vld [vmem:[#allocation7 + $0x190] ss:$24 sps:$4 sm:$0xff]  }
 0x206   :  { %2271 = vmatpush1.bf16.msra.mxu1 %v3989_v41  ;;  %v4076_v41 = vld [vmem:[#allocation7 + $0x548] ss:$24 sps:$4 sm:$0xff]  }
 0x207   :  { %2320 = vmatpush1.bf16.msra.mxu0 %v3992_v42  ;;  %2272 = vmatprep.subr.bf16.mxu1 %v3997_v43  ;;  %v4081_v42 = vld [vmem:[#allocation7 + $0x1c4] ss:$24 sps:$4 sm:$0xff]  }
 0x208   :  { %2321 = vmatprep.subr.bf16.mxu0 %v4000_v45  ;;  %v4084_v43 = vld [vmem:[#allocation7 + $0x57c] ss:$24 sps:$4 sm:$0xff]   ;;  %v4079_v45 = vld [vmem:[#allocation7 + $0x1c0] ss:$24 sps:$4 sm:$0xff]  }
 0x20a   :  { %2273 = vmatpush1.bf16.msra.mxu1 %v3995_v46  ;;  %v4082_v46 = vld [vmem:[#allocation7 + $0x578] ss:$24 sps:$4 sm:$0xff]  }
 0x20b   :  { %2322 = vmatpush1.bf16.msra.mxu0 %v3998_v47  ;;  %2274 = vmatprep.subr.bf16.mxu1 %v4003_v48  ;;  %v4087_v47 = vld [vmem:[#allocation7 + $0x1f4] ss:$24 sps:$4 sm:$0xff]  }
 0x20c   :  { %2332 = vmatprep.subr.bf16.mxu0 %v4006_v49  ;;  %v4090_v48 = vld [vmem:[#allocation7 + $0x5ac] ss:$24 sps:$4 sm:$0xff]   ;;  %v4085_v49 = vld [vmem:[#allocation7 + $0x1f0] ss:$24 sps:$4 sm:$0xff]  }
 0x20e   :  { %2275 = vmatpush1.bf16.msra.mxu1 %v4001_v50  ;;  %2324 = vmatmul.mubr.bf16.vlgmr.msra.gmra.mrb[8].mxu0 %v4598_v44  ;;  %v4088_v50 = vld [vmem:[#allocation7 + $0x5a8] ss:$24 sps:$4 sm:$0xff]  }
 0x20f   :  { %2333 = vmatpush1.bf16.msra.mxu0 %v4004_v51  ;;  %2364 = vmatprep.mubr.bf16.mxu0 %v4603_v56  ;;  %v4093_v51 = vld [vmem:[#allocation7 + $0x224] ss:$24 sps:$4 sm:$0xff]  }
 0x210   :  { %2276 = vmatprep.subr.bf16.mxu1 %v4009_v52  ;;  %2334 = vmatprep.subr.bf16.mxu0 %v4012_v53  ;;  %v4096_v52 = vld [vmem:[#allocation7 + $0x5dc] ss:$24 sps:$4 sm:$0xff]   ;;  %v4091_v53 = vld [vmem:[#allocation7 + $0x220] ss:$24 sps:$4 sm:$0xff]  }
 0x212   :  { %2277 = vmatpush1.bf16.msra.mxu1 %v4007_v54  ;;  %v4094_v54 = vld [vmem:[#allocation7 + $0x5d8] ss:$24 sps:$4 sm:$0xff]  }
 0x213   :  { %2335 = vmatpush1.bf16.msra.mxu0 %v4010_v55  ;;  %2278 = vmatprep.subr.bf16.mxu1 %v4015_v57  ;;  %v4099_v55 = vld [vmem:[#allocation7 + $0x254] ss:$24 sps:$4 sm:$0xff]  }
 0x214   :  { %2336 = vmatprep.subr.bf16.mxu0 %v4018_v58  ;;  %v4102_v57 = vld [vmem:[#allocation7 + $0x60c] ss:$24 sps:$4 sm:$0xff]   ;;  %v4097_v58 = vld [vmem:[#allocation7 + $0x250] ss:$24 sps:$4 sm:$0xff]  }
 0x216   :  { %2279 = vmatpush1.bf16.msra.mxu1 %v4013_v60  ;;  %v4100_v60 = vld [vmem:[#allocation7 + $0x608] ss:$24 sps:$4 sm:$0xff]  }
 0x217   :  { %2337 = vmatpush1.bf16.msra.mxu0 %v4016_v61  ;;  %2280 = vmatprep.subr.bf16.mxu1 %v4021_v62  ;;  %v4105_v61 = vld [vmem:[#allocation7 + $0x284] ss:$24 sps:$4 sm:$0xff]  }
 0x218   :  { %2338 = vmatprep.subr.bf16.mxu0 %v4024_v1  ;;  %v4108_v62 = vld [vmem:[#allocation7 + $0x63c] ss:$24 sps:$4 sm:$0xff]   ;;  %v4103_v1 = vld [vmem:[#allocation7 + $0x280] ss:$24 sps:$4 sm:$0xff]  }
 0x21a   :  { %2281 = vmatpush1.bf16.msra.mxu1 %v4019_v2  ;;  %v4106_v2 = vld [vmem:[#allocation7 + $0x638] ss:$24 sps:$4 sm:$0xff]  }
 0x21b   :  { %2339 = vmatpush1.bf16.msra.mxu0 %v4022_v3  ;;  %2414 = vmatprep.subr.bf16.mxu1 %v4027_v4  ;;  %v4111_v3 = vld [vmem:[#allocation7 + $0x2b4] ss:$24 sps:$4 sm:$0xff]  }
 0x21c   :  { %2340 = vmatprep.subr.bf16.mxu0 %v4030_v5  ;;  %v4114_v4 = vld [vmem:[#allocation7 + $0x66c] ss:$24 sps:$4 sm:$0xff]   ;;  %v4109_v5 = vld [vmem:[#allocation7 + $0x2b0] ss:$24 sps:$4 sm:$0xff]  }
 0x21d   :  { %2283 = vmatmul.mubr.bf16.vlgmr.msra.gmra.mrb[8].mxu1 %v4616_v7 }
 0x21e   :  { %2415 = vmatpush1.bf16.msra.mxu1 %v4025_v6  ;;  %2446 = vmatprep.mubr.bf16.mxu1 %v4596_v40  ;;  %v4046_v40 = vld [vmem:[#allocation7 + $0x458] ss:$24 sps:$4 sm:$0xff]   ;;  %v4112_v6 = vld [vmem:[#allocation7 + $0x668] ss:$24 sps:$4 sm:$0xff]  }
 0x21f   :  { %2341 = vmatpush1.bf16.msra.mxu0 %v4028_v8  ;;  %2416 = vmatprep.subr.bf16.mxu1 %v4033_v9  ;;  %v4117_v8 = vld [vmem:[#allocation7 + $0x2e4] ss:$24 sps:$4 sm:$0xff]  }
 0x220   :  { %2342 = vmatprep.subr.bf16.mxu0 %v4036_v10  ;;  %v4120_v9 = vld [vmem:[#allocation7 + $0x69c] ss:$24 sps:$4 sm:$0xff]   ;;  %v4115_v10 = vld [vmem:[#allocation7 + $0x2e0] ss:$24 sps:$4 sm:$0xff]  }
 0x222   :  { %2417 = vmatpush1.bf16.msra.mxu1 %v4031_v11  ;;  %v4118_v11 = vld [vmem:[#allocation7 + $0x698] ss:$24 sps:$4 sm:$0xff]  }
 0x223   :  { %2343 = vmatpush1.bf16.msra.mxu0 %v4034_v12  ;;  %2418 = vmatprep.subr.bf16.mxu1 %v4039_v13  ;;  %v4123_v12 = vld [vmem:[#allocation7 + $0x314] ss:$24 sps:$4 sm:$0xff]  }
 0x224   :  { %2344 = vmatprep.subr.bf16.mxu0 %v4042_v14  ;;  %v4126_v13 = vld [vmem:[#allocation7 + $0x6cc] ss:$24 sps:$4 sm:$0xff]   ;;  %v4121_v14 = vld [vmem:[#allocation7 + $0x310] ss:$24 sps:$4 sm:$0xff]  }
 0x226   :  { %2419 = vmatpush1.bf16.msra.mxu1 %v4037_v37  ;;  %v4124_v37 = vld [vmem:[#allocation7 + $0x6c8] ss:$24 sps:$4 sm:$0xff]  }
 0x227   :  { %2345 = vmatpush1.bf16.msra.mxu0 %v4040_v15  ;;  %2420 = vmatprep.subr.bf16.mxu1 %v4045_v16  ;;  %v4129_v15 = vld [vmem:[#allocation7 + $0x344] ss:$24 sps:$4 sm:$0xff]  }
 0x228   :  { %2346 = vmatprep.subr.bf16.mxu0 %v4048_v17  ;;  %v4132_v16 = vld [vmem:[#allocation7 + $0x6fc] ss:$24 sps:$4 sm:$0xff]   ;;  %v4127_v17 = vld [vmem:[#allocation7 + $0x340] ss:$24 sps:$4 sm:$0xff]  }
 0x22a   :  { %2421 = vmatpush1.bf16.msra.mxu1 %v4043_v18  ;;  %v4130_v18 = vld [vmem:[#allocation7 + $0x6f8] ss:$24 sps:$4 sm:$0xff]  }
 0x22b   :  { %2347 = vmatpush1.bf16.msra.mxu0 %v4046_v40  ;;  %2422 = vmatprep.subr.bf16.mxu1 %v4051_v19  ;;  %v4135_v40 = vld [vmem:[#allocation7 + $0x374] ss:$24 sps:$4 sm:$0xff]  }
 0x22c   :  { %2348 = vmatprep.subr.bf16.mxu0 %v4054_v21  ;;  %v4138_v19 = vld [vmem:[#allocation7 + $0x72c] ss:$24 sps:$4 sm:$0xff]   ;;  %v4133_v21 = vld [vmem:[#allocation7 + $0x370] ss:$24 sps:$4 sm:$0xff]  }
 0x22e   :  { %2423 = vmatpush1.bf16.msra.mxu1 %v4049_v22  ;;  %v4136_v22 = vld [vmem:[#allocation7 + $0x728] ss:$24 sps:$4 sm:$0xff]  }
 0x22f   :  { %2349 = vmatpush1.bf16.msra.mxu0 %v4052_v23  ;;  %2424 = vmatprep.subr.bf16.mxu1 %v4057_v24  ;;  %v4141_v23 = vld [vmem:[#allocation7 + $0x3a4] ss:$24 sps:$4 sm:$0xff]  }
 0x230   :  { %2350 = vmatprep.subr.bf16.mxu0 %v4060_v25  ;;  %v4144_v24 = vld [vmem:[#allocation7 + $0x75c] ss:$24 sps:$4 sm:$0xff]  }
 0x231   :  { %v4147_v25 = vld [vmem:[#allocation7 + $0x3d4] ss:$24 sps:$4 sm:$0xff]  }
 0x232   :  { %2425 = vmatpush1.bf16.msra.mxu1 %v4055_v26  ;;  %v4150_v26 = vld [vmem:[#allocation7 + $0x78c] ss:$24 sps:$4 sm:$0xff]  }
 0x233   :  { %2351 = vmatpush1.bf16.msra.mxu0 %v4058_v27  ;;  %2426 = vmatprep.subr.bf16.mxu1 %v4063_v28  ;;  %v4145_v27 = vld [vmem:[#allocation7 + $0x3d0] ss:$24 sps:$4 sm:$0xff]  }
 0x234   :  { %2352 = vmatprep.subr.bf16.mxu0 %v4066_v29  ;;  %v4148_v28 = vld [vmem:[#allocation7 + $0x788] ss:$24 sps:$4 sm:$0xff]   ;;  %v4153_v29 = vld [vmem:[#allocation7 + $0x404] ss:$24 sps:$4 sm:$0xff]  }
 0x236   :  { %2427 = vmatpush1.bf16.msra.mxu1 %v4061_v30  ;;  %v4156_v30 = vld [vmem:[#allocation7 + $0x7bc] ss:$24 sps:$4 sm:$0xff]  }
 0x237   :  { %2353 = vmatpush1.bf16.msra.mxu0 %v4064_v31  ;;  %2428 = vmatprep.subr.bf16.mxu1 %v4069_v32  ;;  %v4151_v31 = vld [vmem:[#allocation7 + $0x400] ss:$24 sps:$4 sm:$0xff]  }
 0x238   :  { %2354 = vmatprep.subr.bf16.mxu0 %v4072_v33  ;;  %v4154_v32 = vld [vmem:[#allocation7 + $0x7b8] ss:$24 sps:$4 sm:$0xff]   ;;  %v4159_v33 = vld [vmem:[#allocation7 + $0x434] ss:$24 sps:$4 sm:$0xff]  }
 0x23a   :  { %2429 = vmatpush1.bf16.msra.mxu1 %v4067_v34  ;;  %v4162_v34 = vld [vmem:[#allocation7 + $0x7ec] ss:$24 sps:$4 sm:$0xff]  }
 0x23b   :  { %2355 = vmatpush1.bf16.msra.mxu0 %v4070_v35  ;;  %2430 = vmatprep.subr.bf16.mxu1 %v4075_v36  ;;  %v4157_v35 = vld [vmem:[#allocation7 + $0x430] ss:$24 sps:$4 sm:$0xff]  }
 0x23c   :  { %2356 = vmatprep.subr.bf16.mxu0 %v4078_v38  ;;  %v4160_v36 = vld [vmem:[#allocation7 + $0x7e8] ss:$24 sps:$4 sm:$0xff]   ;;  %v4165_v38 = vld [vmem:[#allocation7 + $0x464] ss:$24 sps:$4 sm:$0xff]  }
 0x23e   :  { %2431 = vmatpush1.bf16.msra.mxu1 %v4073_v39  ;;  %v4168_v39 = vld [vmem:[#allocation7 + $0x81c] ss:$24 sps:$4 sm:$0xff]  }
 0x23f   :  { %2357 = vmatpush1.bf16.msra.mxu0 %v4076_v41  ;;  %2432 = vmatprep.subr.bf16.mxu1 %v4081_v42  ;;  %v4163_v41 = vld [vmem:[#allocation7 + $0x460] ss:$24 sps:$4 sm:$0xff]  }
 0x240   :  { %2358 = vmatprep.subr.bf16.mxu0 %v4084_v43  ;;  %v4166_v42 = vld [vmem:[#allocation7 + $0x818] ss:$24 sps:$4 sm:$0xff]   ;;  %v4171_v43 = vld [vmem:[#allocation7 + $0x494] ss:$24 sps:$4 sm:$0xff]  }
 0x242   :  { %2433 = vmatpush1.bf16.msra.mxu1 %v4079_v45  ;;  %v4174_v45 = vld [vmem:[#allocation7 + $0x84c] ss:$24 sps:$4 sm:$0xff]  }
 0x243   :  { %2359 = vmatpush1.bf16.msra.mxu0 %v4082_v46  ;;  %2434 = vmatprep.subr.bf16.mxu1 %v4087_v47  ;;  %v4169_v46 = vld [vmem:[#allocation7 + $0x490] ss:$24 sps:$4 sm:$0xff]  }
 0x244   :  { %2360 = vmatprep.subr.bf16.mxu0 %v4090_v48  ;;  %v4172_v47 = vld [vmem:[#allocation7 + $0x848] ss:$24 sps:$4 sm:$0xff]   ;;  %v4177_v48 = vld [vmem:[#allocation7 + $0x4c4] ss:$24 sps:$4 sm:$0xff]  }
 0x246   :  { %2435 = vmatpush1.bf16.msra.mxu1 %v4085_v49  ;;  %v4180_v49 = vld [vmem:[#allocation7 + $0x87c] ss:$24 sps:$4 sm:$0xff]  }
 0x247   :  { %2361 = vmatpush1.bf16.msra.mxu0 %v4088_v50  ;;  %2436 = vmatprep.subr.bf16.mxu1 %v4093_v51  ;;  %v4175_v50 = vld [vmem:[#allocation7 + $0x4c0] ss:$24 sps:$4 sm:$0xff]  }
 0x248   :  { %2362 = vmatprep.subr.bf16.mxu0 %v4096_v52  ;;  %v4178_v51 = vld [vmem:[#allocation7 + $0x878] ss:$24 sps:$4 sm:$0xff]   ;;  %v4183_v52 = vld [vmem:[#allocation7 + $0x4f4] ss:$24 sps:$4 sm:$0xff]  }
 0x24a   :  { %2437 = vmatpush1.bf16.msra.mxu1 %v4091_v53  ;;  %v4186_v53 = vld [vmem:[#allocation7 + $0x8ac] ss:$24 sps:$4 sm:$0xff]  }
 0x24b   :  { %2363 = vmatpush1.bf16.msra.mxu0 %v4094_v54  ;;  %2438 = vmatprep.subr.bf16.mxu1 %v4099_v55  ;;  %v4181_v54 = vld [vmem:[#allocation7 + $0x4f0] ss:$24 sps:$4 sm:$0xff]  }
 0x24c   :  { %2373 = vmatprep.subr.bf16.mxu0 %v4102_v57  ;;  %v4184_v55 = vld [vmem:[#allocation7 + $0x8a8] ss:$24 sps:$4 sm:$0xff]   ;;  %v4189_v57 = vld [vmem:[#allocation7 + $0x524] ss:$24 sps:$4 sm:$0xff]  }
 0x24e   :  { %2365 = vmatmul.mubr.bf16.vlgmr.msra.gmra.mrb[8].mxu0 %v4605_v59  ;;  %2439 = vmatpush1.bf16.msra.mxu1 %v4097_v58  ;;  %v4192_v58 = vld [vmem:[#allocation7 + $0x8dc] ss:$24 sps:$4 sm:$0xff]  }
 0x24f   :  { %2374 = vmatpush1.bf16.msra.mxu0 %v4100_v60  ;;  %2405 = vmatprep.mubr.bf16.mxu0 %v4607_v63  ;;  %v4187_v60 = vld [vmem:[#allocation7 + $0x520] ss:$24 sps:$4 sm:$0xff]  }
 0x250   :  { %2440 = vmatprep.subr.bf16.mxu1 %v4105_v61  ;;  %2375 = vmatprep.subr.bf16.mxu0 %v4108_v62  ;;  %v4190_v61 = vld [vmem:[#allocation7 + $0x8d8] ss:$24 sps:$4 sm:$0xff]   ;;  %v4195_v62 = vld [vmem:[#allocation7 + $0x554] ss:$24 sps:$4 sm:$0xff]  }
 0x252   :  { %2441 = vmatpush1.bf16.msra.mxu1 %v4103_v1  ;;  %v3501_v1 = vld [vmem:[#allocation10 + $0x40] sm:$0xff]  }
 0x253   :  { %2376 = vmatpush1.bf16.msra.mxu0 %v4106_v2  ;;  %2442 = vmatprep.subr.bf16.mxu1 %v4111_v3  ;;  %v4193_v2 = vld [vmem:[#allocation7 + $0x550] ss:$24 sps:$4 sm:$0xff]   ;;  %v4198_v3 = vld [vmem:[#allocation7 + $0x584] ss:$24 sps:$4 sm:$0xff]  }
 0x254   :  { %2377 = vmatprep.subr.bf16.mxu0 %v4114_v4  ;;  %v3303_v4 = vld [vmem:[#allocation10] sm:$0xff]  }
 0x256   :  { %2443 = vmatpush1.bf16.msra.mxu1 %v4109_v5  ;;  %v3502_v5 = vld [vmem:[#allocation10 + $0x48] sm:$0xff]  }
 0x257   :  { %2378 = vmatpush1.bf16.msra.mxu0 %v4112_v6  ;;  %2444 = vmatprep.subr.bf16.mxu1 %v4117_v8  ;;  %v4196_v6 = vld [vmem:[#allocation7 + $0x580] ss:$24 sps:$4 sm:$0xff]   ;;  %v4201_v8 = vld [vmem:[#allocation7 + $0x5b4] ss:$24 sps:$4 sm:$0xff]  }
 0x258   :  { %2379 = vmatprep.subr.bf16.mxu0 %v4120_v9  ;;  %v3494_v9 = vld [vmem:[#allocation10 + $0x8] sm:$0xff]  }
 0x25a   :  { %2445 = vmatpush1.bf16.msra.mxu1 %v4115_v10  ;;  %v3503_v10 = vld [vmem:[#allocation10 + $0x50] sm:$0xff]  }
 0x25b   :  { %2380 = vmatpush1.bf16.msra.mxu0 %v4118_v11  ;;  %2455 = vmatprep.subr.bf16.mxu1 %v4123_v12  ;;  %v4199_v11 = vld [vmem:[#allocation7 + $0x5b0] ss:$24 sps:$4 sm:$0xff]   ;;  %v4204_v12 = vld [vmem:[#allocation7 + $0x5e4] ss:$24 sps:$4 sm:$0xff]  }
 0x25c   :  { %2381 = vmatprep.subr.bf16.mxu0 %v4126_v13  ;;  %v3495_v13 = vld [vmem:[#allocation10 + $0x10] sm:$0xff]  }
 0x25d   :  { %2447 = vmatmul.mubr.bf16.vlgmr.msra.gmra.mrb[12].mxu1 %v4598_v44  ;;  %v4139_v44 = vld [vmem:[#allocation7 + $0x3a0] ss:$24 sps:$4 sm:$0xff]  }
 0x25e   :  { %2456 = vmatpush1.bf16.msra.mxu1 %v4121_v14  ;;  %2487 = vmatprep.mubr.bf16.mxu1 %v4603_v56  ;;  %v4142_v56 = vld [vmem:[#allocation7 + $0x758] ss:$24 sps:$4 sm:$0xff]   ;;  %v3504_v14 = vld [vmem:[#allocation10 + $0x58] sm:$0xff]  }
 0x25f   :  { %2382 = vmatpush1.bf16.msra.mxu0 %v4124_v37  ;;  %2457 = vmatprep.subr.bf16.mxu1 %v4129_v15  ;;  %v4202_v37 = vld [vmem:[#allocation7 + $0x5e0] ss:$24 sps:$4 sm:$0xff]   ;;  %v4207_v15 = vld [vmem:[#allocation7 + $0x614] ss:$24 sps:$4 sm:$0xff]  }
 0x260   :  { %2383 = vmatprep.subr.bf16.mxu0 %v4132_v16  ;;  %v3496_v16 = vld [vmem:[#allocation10 + $0x18] sm:$0xff]  }
 0x262   :  { %2458 = vmatpush1.bf16.msra.mxu1 %v4127_v17  ;;  %v3505_v17 = vld [vmem:[#allocation10 + $0x60] sm:$0xff]  }
 0x263   :  { %2384 = vmatpush1.bf16.msra.mxu0 %v4130_v18  ;;  %2459 = vmatprep.subr.bf16.mxu1 %v4135_v40  ;;  %v4205_v18 = vld [vmem:[#allocation7 + $0x610] ss:$24 sps:$4 sm:$0xff]   ;;  %v4210_v40 = vld [vmem:[#allocation7 + $0x644] ss:$24 sps:$4 sm:$0xff]  }
 0x264   :  { %2385 = vmatprep.subr.bf16.mxu0 %v4138_v19  ;;  %v3497_v19 = vld [vmem:[#allocation10 + $0x20] sm:$0xff]  }
 0x266   :  { %2460 = vmatpush1.bf16.msra.mxu1 %v4133_v21  ;;  %v3506_v21 = vld [vmem:[#allocation10 + $0x68] sm:$0xff]  }
 0x267   :  { %2386 = vmatpush1.bf16.msra.mxu0 %v4136_v22  ;;  %2461 = vmatprep.subr.bf16.mxu1 %v4141_v23  ;;  %v4208_v22 = vld [vmem:[#allocation7 + $0x640] ss:$24 sps:$4 sm:$0xff]   ;;  %v4213_v23 = vld [vmem:[#allocation7 + $0x674] ss:$24 sps:$4 sm:$0xff]  }
 0x268   :  { %2387 = vmatprep.subr.bf16.mxu0 %v4144_v24 }
 0x26a   :  { %2462 = vmatpush1.bf16.msra.mxu1 %v4139_v44  ;;  %v3498_v44 = vld [vmem:[#allocation10 + $0x28] sm:$0xff]  }
 0x26b   :  { %2388 = vmatpush1.bf16.msra.mxu0 %v4142_v56  ;;  %2463 = vmatprep.subr.bf16.mxu1 %v4147_v25  ;;  %v3507_v25 = vld [vmem:[#allocation10 + $0x70] sm:$0xff]  }
 0x26c   :  { %2389 = vmatprep.subr.bf16.mxu0 %v4150_v26 }
 0x26e   :  { %2464 = vmatpush1.bf16.msra.mxu1 %v4145_v27  ;;  %v4211_v27 = vld [vmem:[#allocation7 + $0x670] ss:$24 sps:$4 sm:$0xff]  }
 0x26f   :  { %2390 = vmatpush1.bf16.msra.mxu0 %v4148_v28  ;;  %2465 = vmatprep.subr.bf16.mxu1 %v4153_v29  ;;  %v3508_v29 = vld [vmem:[#allocation10 + $0x78] sm:$0xff]  }
 0x270   :  { %2391 = vmatprep.subr.bf16.mxu0 %v4156_v30  ;;  %v4214_v30 = vld [vmem:[#allocation7 + $0x6a0] ss:$24 sps:$4 sm:$0xff]  }
 0x272   :  { %2466 = vmatpush1.bf16.msra.mxu1 %v4151_v31  ;;  %v4219_v31 = vld [vmem:[#allocation7 + $0x6d4] ss:$24 sps:$4 sm:$0xff]  }
 0x273   :  { %2392 = vmatpush1.bf16.msra.mxu0 %v4154_v32  ;;  %2467 = vmatprep.subr.bf16.mxu1 %v4159_v33  ;;  %v3500_v32 = vld [vmem:[#allocation10 + $0x38] sm:$0xff]   ;;  %v3517_v33 = vld [vmem:[#allocation10 + $0xc0] sm:$0xff]  }
 0x274   :  { %2393 = vmatprep.subr.bf16.mxu0 %v4162_v34  ;;  %v4217_v34 = vld [vmem:[#allocation7 + $0x6d0] ss:$24 sps:$4 sm:$0xff]  }
 0x276   :  { %2468 = vmatpush1.bf16.msra.mxu1 %v4157_v35  ;;  %v4222_v35 = vld [vmem:[#allocation7 + $0x704] ss:$24 sps:$4 sm:$0xff]  }
 0x277   :  { %2394 = vmatpush1.bf16.msra.mxu0 %v4160_v36  ;;  %2469 = vmatprep.subr.bf16.mxu1 %v4165_v38  ;;  %v4220_v36 = vld [vmem:[#allocation7 + $0x700] ss:$24 sps:$4 sm:$0xff]   ;;  %v4225_v38 = vld [vmem:[#allocation7 + $0x734] ss:$24 sps:$4 sm:$0xff]  }
 0x278   :  { %2395 = vmatprep.subr.bf16.mxu0 %v4168_v39  ;;  %v4223_v39 = vld [vmem:[#allocation7 + $0x730] ss:$24 sps:$4 sm:$0xff]  }
 0x27a   :  { %2470 = vmatpush1.bf16.msra.mxu1 %v4163_v41  ;;  %v4228_v41 = vld [vmem:[#allocation7 + $0x764] ss:$24 sps:$4 sm:$0xff]  }
 0x27b   :  { %2396 = vmatpush1.bf16.msra.mxu0 %v4166_v42  ;;  %2471 = vmatprep.subr.bf16.mxu1 %v4171_v43  ;;  %v4226_v42 = vld [vmem:[#allocation7 + $0x760] ss:$24 sps:$4 sm:$0xff]   ;;  %v4231_v43 = vld [vmem:[#allocation7 + $0x794] ss:$24 sps:$4 sm:$0xff]  }
 0x27c   :  { %2397 = vmatprep.subr.bf16.mxu0 %v4174_v45  ;;  %v4229_v45 = vld [vmem:[#allocation7 + $0x790] ss:$24 sps:$4 sm:$0xff]  }
 0x27e   :  { %2472 = vmatpush1.bf16.msra.mxu1 %v4169_v46  ;;  %v4234_v46 = vld [vmem:[#allocation7 + $0x7c4] ss:$24 sps:$4 sm:$0xff]  }
 0x27f   :  { %2398 = vmatpush1.bf16.msra.mxu0 %v4172_v47  ;;  %2473 = vmatprep.subr.bf16.mxu1 %v4177_v48  ;;  %v4232_v47 = vld [vmem:[#allocation7 + $0x7c0] ss:$24 sps:$4 sm:$0xff]   ;;  %v4237_v48 = vld [vmem:[#allocation7 + $0x7f4] ss:$24 sps:$4 sm:$0xff]  }
 0x280   :  { %2399 = vmatprep.subr.bf16.mxu0 %v4180_v49  ;;  %v4235_v49 = vld [vmem:[#allocation7 + $0x7f0] ss:$24 sps:$4 sm:$0xff]  }
 0x282   :  { %2474 = vmatpush1.bf16.msra.mxu1 %v4175_v50  ;;  %v4240_v50 = vld [vmem:[#allocation7 + $0x824] ss:$24 sps:$4 sm:$0xff]  }
 0x283   :  { %2400 = vmatpush1.bf16.msra.mxu0 %v4178_v51  ;;  %2475 = vmatprep.subr.bf16.mxu1 %v4183_v52  ;;  %v4238_v51 = vld [vmem:[#allocation7 + $0x820] ss:$24 sps:$4 sm:$0xff]   ;;  %v4243_v52 = vld [vmem:[#allocation7 + $0x854] ss:$24 sps:$4 sm:$0xff]  }
 0x284   :  { %2401 = vmatprep.subr.bf16.mxu0 %v4186_v53  ;;  %v4241_v53 = vld [vmem:[#allocation7 + $0x850] ss:$24 sps:$4 sm:$0xff]  }
 0x286   :  { %2476 = vmatpush1.bf16.msra.mxu1 %v4181_v54  ;;  %v4246_v54 = vld [vmem:[#allocation7 + $0x884] ss:$24 sps:$4 sm:$0xff]  }
 0x287   :  { %2402 = vmatpush1.bf16.msra.mxu0 %v4184_v55  ;;  %2477 = vmatprep.subr.bf16.mxu1 %v4189_v57  ;;  %v4244_v55 = vld [vmem:[#allocation7 + $0x880] ss:$24 sps:$4 sm:$0xff]   ;;  %v4249_v57 = vld [vmem:[#allocation7 + $0x8b4] ss:$24 sps:$4 sm:$0xff]  }
 0x288   :  { %2403 = vmatprep.subr.bf16.mxu0 %v4192_v58  ;;  %v4247_v58 = vld [vmem:[#allocation7 + $0x8b0] ss:$24 sps:$4 sm:$0xff]  }
 0x28a   :  { %2478 = vmatpush1.bf16.msra.mxu1 %v4187_v60  ;;  %v4252_v60 = vld [vmem:[#allocation7 + $0x8e4] ss:$24 sps:$4 sm:$0xff]  }
 0x28b   :  { %2404 = vmatpush1.bf16.msra.mxu0 %v4190_v61  ;;  %2479 = vmatprep.subr.bf16.mxu1 %v4195_v62  ;;  %v4250_v61 = vld [vmem:[#allocation7 + $0x8e0] ss:$24 sps:$4 sm:$0xff]   ;;  %v4633_v62 = vshrl.u32 %v122_v20, 7 }
 0x28c   :  { %3647 = vmatprep.subr.bf16.mxu0 %v3501_v1 }
 0x28d   :  { %v700_v1 = vsub.s32 0, %v4633_v62 }
 0x28e   :  { %2406 = vmatmul.mubr.bf16.vlgmr.msra.gmra.mrb[8].mxu0 %v4616_v7  ;;  %2480 = vmatpush1.bf16.msra.mxu1 %v4193_v2  ;;  %v4636_v2 = vld [vmem:[#allocation8] sm:$0x3f] }
 0x28f   :  { %2481 = vmatprep.subr.bf16.mxu1 %v4198_v3  ;;  %3649 = vmatpush3.bf16.msra.mxu0 %v3303_v4  ;;  %v704_v3 = vsub.s32 1, %v4633_v62  ;;  %v701_v4 = vrot.slane %v4636_v2, %v700_v1  ;;  %v3540_v1 = vld [vmem:[#allocation10 + $0x178] sm:$0xff]  }
 0x290   :  { %3651 = vmatprep.subr.bf16.mxu0 %v3502_v5 }
 0x291   :  { %v705_v5 = vrot.slane %v4636_v2, %v704_v3  ;;  %v3532_v3 = vld [vmem:[#allocation10 + $0x138] sm:$0xff]  }
 0x292   :  { %2482 = vmatpush1.bf16.msra.mxu1 %v4196_v6 }
 0x293   :  { %2483 = vmatprep.subr.bf16.mxu1 %v4201_v8  ;;  %3653 = vmatpush3.bf16.msra.mxu0 %v3494_v9 }
 0x294   :  { %3655 = vmatprep.subr.bf16.mxu0 %v3503_v10 }
 0x296   :  { %2484 = vmatpush1.bf16.msra.mxu1 %v4199_v11 }
 0x297   :  { %2485 = vmatprep.subr.bf16.mxu1 %v4204_v12  ;;  %3657 = vmatpush3.bf16.msra.mxu0 %v3495_v13 }
 0x298   :  { %3659 = vmatprep.subr.bf16.mxu0 %v3504_v14  ;;  %v3509_v14 = vld [vmem:[#allocation10 + $0x80] sm:$0xff]  }
 0x29a   :  { %2486 = vmatpush1.bf16.msra.mxu1 %v4202_v37 }
 0x29b   :  { %2496 = vmatprep.subr.bf16.mxu1 %v4207_v15  ;;  %3661 = vmatpush3.bf16.msra.mxu0 %v3496_v16  ;;  %v3518_v15 = vld [vmem:[#allocation10 + $0xc8] sm:$0xff]  }
 0x29c   :  { %3663 = vmatprep.subr.bf16.mxu0 %v3505_v17  ;;  %v3510_v16 = vld [vmem:[#allocation10 + $0x88] sm:$0xff]   ;;  %v3519_v17 = vld [vmem:[#allocation10 + $0xd0] sm:$0xff]  }
 0x29d   :  { %2488 = vmatmul.mubr.bf16.vlgmr.msra.gmra.mrb[12].mxu1 %v4605_v59  ;;  %v4216_v59 = vld [vmem:[#allocation7 + $0x6a4] ss:$24 sps:$4 sm:$0xff]  }
 0x29e   :  { %2497 = vmatpush1.bf16.msra.mxu1 %v4205_v18  ;;  %2528 = vmatprep.mubr.bf16.mxu1 %v4607_v63  ;;  %v3499_v63 = vld [vmem:[#allocation10 + $0x30] sm:$0xff]  }
 0x29f   :  { %2498 = vmatprep.subr.bf16.mxu1 %v4210_v40  ;;  %3665 = vmatpush3.bf16.msra.mxu0 %v3497_v19  ;;  %v3511_v18 = vld [vmem:[#allocation10 + $0x90] sm:$0xff]   ;;  %v3520_v40 = vld [vmem:[#allocation10 + $0xd8] sm:$0xff]  }
 0x2a0   :  { %v4627_v24 = vpop.f32.mrb[4].mxu0  ;;  %3667 = vmatprep.subr.bf16.mxu0 %v3506_v21  ;;  %v3512_v19 = vld [vmem:[#allocation10 + $0x98] sm:$0xff]   ;;  %v3521_v21 = vld [vmem:[#allocation10 + $0xe0] sm:$0xff]  }
 0x2a1   :  { %v4629_v56 = vpop.f32.mrb[5].mxu0  ;;  %v2203_v6 = vadd.f32 %v4627_v24, %v701_v4  ;;  %v3514_v24 = vld [vmem:[#allocation10 + $0xa8] sm:$0xff]   ;;  %v716_v4 = vsub.s32 4, %v4633_v62 }
 0x2a2   :  { %2499 = vmatpush1.bf16.msra.mxu1 %v4208_v22  ;;  %v2206_v26 = vpop.f32.mrb[6].mxu0  ;;  %v2205_v8 = vadd.f32 %v4629_v56, %v705_v5  ;;  %v3513_v22 = vld [vmem:[#allocation10 + $0xa0] sm:$0xff]   ;;  %v3515_v56 = vld [vmem:[#allocation10 + $0xb0] sm:$0xff]   ;;  %v720_v5 = vsub.s32 5, %v4633_v62 }
 0x2a3   :  { %v2207_v28 = vpop.f32.mrb[7].mxu0  ;;  %2500 = vmatprep.subr.bf16.mxu1 %v4213_v23  ;;  %3669 = vmatpush3.bf16.msra.mxu0 %v3498_v44  ;;  %v3522_v23 = vld [vmem:[#allocation10 + $0xe8] sm:$0xff]   ;;  %v3523_v44 = vld [vmem:[#allocation10 + $0xf0] sm:$0xff]   ;;  %v3516_v26 = vld [vmem:[#allocation10 + $0xb8] sm:$0xff]  }
 0x2a4   :  { %3671 = vmatprep.subr.bf16.mxu0 %v3507_v25  ;;  %v3524_v25 = vld [vmem:[#allocation10 + $0xf8] sm:$0xff]  }
 0x2a5   :  { %v4265_v28 = vld [vmem:[#allocation2] sm:$0xff] }
 0x2a6   :  { %2501 = vmatpush1.bf16.msra.mxu1 %v4211_v27  ;;  %v3533_v27 = vld [vmem:[#allocation10 + $0x140] sm:$0xff]   ;;  %vm105_vm2 = vcmp.ne.s32.totalorder %v4265_v28, 0 }
 0x2a7   :  { %2502 = vmatprep.subr.bf16.mxu1 %v4216_v59  ;;  %3673 = vmatpush3.bf16.msra.mxu0 %v3499_v63  ;;  %v106_v59 = vsel %vm105_vm2, 1, %v4464_v0 }
 0x2a8   :  { %3675 = vmatprep.subr.bf16.mxu0 %v3508_v29  ;;  %v108_v63 = vsel %vm107_vm3, %v106_v59, 0 }
 0x2a9   :  { %v110_v29 = vshrl.u32 %v108_v63, 16 }
 0x2aa   :  { %2503 = vmatpush1.bf16.msra.mxu1 %v4214_v30  ;;  %v109_v30 = vand.u32 65535, %v108_v63 }
 0x2ab   :  { %2504 = vmatprep.subr.bf16.mxu1 %v4219_v31  ;;  %3677 = vmatpush3.bf16.msra.mxu0 %v3500_v32  ;;  %v708_v31 = vsub.s32 2, %v4633_v62  ;;  %v712_v32 = vsub.s32 3, %v4633_v62 }
 0x2ac   :  { %3679 = vmatprep.subr.bf16.mxu0 %v3517_v33  ;;  %v112_v33 = vcvt.s32.f32 %v110_v29 }
 0x2ae   :  { %2505 = vmatpush1.bf16.msra.mxu1 %v4217_v34  ;;  %v111_v34 = vcvt.s32.f32 %v109_v30  ;;  %115 = vadd.xlane.f32.xlu0 %v112_v33 }
 0x2af   :  { %2506 = vmatprep.subr.bf16.mxu1 %v4222_v35  ;;  %v709_v35 = vrot.slane %v4636_v2, %v708_v31 }
 0x2b0   :  { %113 = vadd.xlane.f32.xlu1 %v111_v34 }
 0x2b2   :  { %2507 = vmatpush1.bf16.msra.mxu1 %v4220_v36  ;;  %v713_v36 = vrot.slane %v4636_v2, %v712_v32 }
 0x2b3   :  { %2508 = vmatprep.subr.bf16.mxu1 %v4225_v38 }
 0x2b6   :  { %2509 = vmatpush1.bf16.msra.mxu1 %v4223_v39 }
 0x2b7   :  { %2510 = vmatprep.subr.bf16.mxu1 %v4228_v41 }
 0x2ba   :  { %2511 = vmatpush1.bf16.msra.mxu1 %v4226_v42 }
 0x2bb   :  { %2512 = vmatprep.subr.bf16.mxu1 %v4231_v43 }
 0x2be   :  { %2513 = vmatpush1.bf16.msra.mxu1 %v4229_v45 }
 0x2bf   :  { %2514 = vmatprep.subr.bf16.mxu1 %v4234_v46  ;;  %v3525_v46 = vld [vmem:[#allocation10 + $0x100] sm:$0xff]  }
 0x2c2   :  { %2515 = vmatpush1.bf16.msra.mxu1 %v4232_v47 }
 0x2c3   :  { %2516 = vmatprep.subr.bf16.mxu1 %v4237_v48  ;;  %v3534_v48 = vld [vmem:[#allocation10 + $0x148] sm:$0xff]  }
 0x2c6   :  { %2517 = vmatpush1.bf16.msra.mxu1 %v4235_v49  ;;  %v3526_v49 = vld [vmem:[#allocation10 + $0x108] sm:$0xff]  }
 0x2c7   :  { %2518 = vmatprep.subr.bf16.mxu1 %v4240_v50  ;;  %v3535_v50 = vld [vmem:[#allocation10 + $0x150] sm:$0xff]  }
 0x2ca   :  { %2519 = vmatpush1.bf16.msra.mxu1 %v4238_v51  ;;  %v3527_v51 = vld [vmem:[#allocation10 + $0x110] sm:$0xff]  }
 0x2cb   :  { %2520 = vmatprep.subr.bf16.mxu1 %v4243_v52  ;;  %v3536_v52 = vld [vmem:[#allocation10 + $0x158] sm:$0xff]  }
 0x2ce   :  { %2521 = vmatpush1.bf16.msra.mxu1 %v4241_v53  ;;  %v3528_v53 = vld [vmem:[#allocation10 + $0x118] sm:$0xff]  }
 0x2cf   :  { %2522 = vmatprep.subr.bf16.mxu1 %v4246_v54  ;;  %v3537_v54 = vld [vmem:[#allocation10 + $0x160] sm:$0xff]  }
 0x2d2   :  { %2523 = vmatpush1.bf16.msra.mxu1 %v4244_v55  ;;  %v3529_v55 = vld [vmem:[#allocation10 + $0x120] sm:$0xff]  }
 0x2d3   :  { %2524 = vmatprep.subr.bf16.mxu1 %v4249_v57  ;;  %v3538_v57 = vld [vmem:[#allocation10 + $0x168] sm:$0xff]  }
 0x2d6   :  { %2525 = vmatpush1.bf16.msra.mxu1 %v4247_v58  ;;  %v3530_v58 = vld [vmem:[#allocation10 + $0x128] sm:$0xff]  }
 0x2d7   :  { %2526 = vmatprep.subr.bf16.mxu1 %v4252_v60  ;;  %v3539_v60 = vld [vmem:[#allocation10 + $0x170] sm:$0xff]  }
 0x2da   :  { %2527 = vmatpush1.bf16.msra.mxu1 %v4250_v61  ;;  %v3531_v61 = vld [vmem:[#allocation10 + $0x130] sm:$0xff]  }
 0x2dd   :  { %2529 = vmatmul.mubr.bf16.vlgmr.msra.gmra.mrb[12].mxu1 %v4616_v7 }
 0x2f0   :  { %v2284_v9 = vpop.f32.mrb[8].mxu1 }
 0x2f1   :  { %v3743_v10 = vadd.f32 %v2284_v9, %v2203_v6  ;;  %v2286_v7 = vpop.f32.mrb[9].mxu1  ;;  %v717_v6 = vrot.slane %v4636_v2, %v716_v4 }
 0x2f2   :  { %v3745_v11 = vadd.f32 %v2286_v7, %v2205_v8  ;;  %v2288_v20 = vpop.f32.mrb[10].mxu1  ;;  %v721_v8 = vrot.slane %v4636_v2, %v720_v5 }
 0x2f3   :  { %v2289_v12 = vpop.f32.mrb[11].mxu1 }
 0x2f4   :  { %4253 = vtanh.f32 %v3745_v11 }
 0x2f5   :  { %4255 = vtanh.f32 %v3743_v10 }
 0x2fe   :  { %v4254_v13 = vpop.eup %4253 }
 0x2ff   :  { %v4256_v37 = vpop.eup %4255  ;;  %2806 = vmatprep.mubr.f32.mxu0 %v4254_v13 }
 0x300   :  { %2807 = vmatmul.mubr.f32.vlgmr.msra.gmra.mrb[12].mxu0 %v4256_v37 }
 0x301   :  { %3681 = vmatpush3.bf16.msra.mxu0 %v3509_v14 }
 0x302   :  { %3683 = vmatprep.subr.bf16.mxu0 %v3518_v15 }
 0x305   :  { %3685 = vmatpush3.bf16.msra.mxu0 %v3510_v16 }
 0x306   :  { %3687 = vmatprep.subr.bf16.mxu0 %v3519_v17 }
 0x309   :  { %3689 = vmatpush3.bf16.msra.mxu0 %v3511_v18 }
 0x30a   :  { %3691 = vmatprep.subr.bf16.mxu0 %v3520_v40 }
 0x30d   :  { %3693 = vmatpush3.bf16.msra.mxu0 %v3512_v19 }
 0x30e   :  { %3695 = vmatprep.subr.bf16.mxu0 %v3521_v21 }
 0x311   :  { %3697 = vmatpush3.bf16.msra.mxu0 %v3513_v22 }
 0x312   :  { %3699 = vmatprep.subr.bf16.mxu0 %v3522_v23 }
 0x315   :  { %3701 = vmatpush3.bf16.msra.mxu0 %v3514_v24 }
 0x316   :  { %3703 = vmatprep.subr.bf16.mxu0 %v3523_v44 }
 0x319   :  { %3705 = vmatpush3.bf16.msra.mxu0 %v3515_v56 }
 0x31a   :  { %3707 = vmatprep.subr.bf16.mxu0 %v3524_v25 }
 0x31d   :  { %3709 = vmatpush3.bf16.msra.mxu0 %v3516_v26 }
 0x31e   :  { %3711 = vmatprep.subr.bf16.mxu0 %v3533_v27 }
 0x33b   :  { %v116_v62 = vpop.xlane.xlu0 %115 }
 0x33c   :  { %v118_v17 = vcvt.f32.s32 %v116_v62 }
 0x33d   :  { %v114_v40 = vpop.xlane.xlu1 %113 }
 0x33e   :  { %v119_v18 = vshll.u32 %v118_v17, 16  ;;  %v117_v2 = vcvt.f32.s32 %v114_v40 }
 0x340   :  { %v120_v19 = vadd.s32 %v119_v18, %v117_v2 }
 0x342   :  { %121 = vst [vmem:[#allocation14] sm:$0xff] %v120_v19 }
 0x361   :  { %v2407_v38 = vpop.f32.mrb[8].mxu0 }
 0x362   :  { %v3746_v39 = vadd.f32 %v2407_v38, %v709_v35  ;;  %v2409_v41 = vpop.f32.mrb[9].mxu0 }
 0x363   :  { %v3747_v0 = vadd.f32 %v2409_v41, %v713_v36  ;;  %v2411_v42 = vpop.f32.mrb[10].mxu0 }
 0x364   :  { %v2412_v43 = vpop.f32.mrb[11].mxu0 }
 0x365   :  { %4257 = vtanh.f32 %v3747_v0 }
 0x366   :  { %4259 = vtanh.f32 %v3746_v39 }
 0x36f   :  { %v4258_v45 = vpop.eup %4257 }
 0x370   :  { %v4260_v47 = vpop.eup %4259  ;;  %2876 = vmatprep.mubr.f32.mxu0 %v4258_v45 }
 0x371   :  { %2877 = vmatmul.mubr.f32.vlgmr.msra.gmra.mrb[14].mxu0 %v4260_v47 }
 0x372   :  { %3713 = vmatpush3.bf16.msra.mxu0 %v3525_v46 }
 0x373   :  { %3715 = vmatprep.subr.bf16.mxu0 %v3534_v48 }
 0x376   :  { %3717 = vmatpush3.bf16.msra.mxu0 %v3526_v49 }
 0x377   :  { %3719 = vmatprep.subr.bf16.mxu0 %v3535_v50 }
 0x37a   :  { %3721 = vmatpush3.bf16.msra.mxu0 %v3527_v51 }
 0x37b   :  { %3723 = vmatprep.subr.bf16.mxu0 %v3536_v52 }
 0x37e   :  { %3725 = vmatpush3.bf16.msra.mxu0 %v3528_v53 }
 0x37f   :  { %3727 = vmatprep.subr.bf16.mxu0 %v3537_v54 }
 0x382   :  { %3729 = vmatpush3.bf16.msra.mxu0 %v3529_v55 }
 0x383   :  { %3731 = vmatprep.subr.bf16.mxu0 %v3538_v57 }
 0x386   :  { %3733 = vmatpush3.bf16.msra.mxu0 %v3530_v58 }
 0x387   :  { %3735 = vmatprep.subr.bf16.mxu0 %v3539_v60 }
 0x38a   :  { %3737 = vmatpush3.bf16.msra.mxu0 %v3531_v61 }
 0x38b   :  { %3739 = vmatprep.subr.bf16.mxu0 %v3540_v1 }
 0x38e   :  { %3741 = vmatpush3.bf16.msra.mxu0 %v3532_v3 }
 0x3b0   :  { %v2530_v9 = vpop.f32.mrb[12].mxu1 }
 0x3b1   :  { %v3748_v10 = vadd.f32 %v2530_v9, %v717_v6  ;;  %v2532_v7 = vpop.f32.mrb[13].mxu1 }
 0x3b2   :  { %v3749_v11 = vadd.f32 %v2532_v7, %v721_v8  ;;  %v2534_v20 = vpop.f32.mrb[14].mxu1 }
 0x3b3   :  { %v2535_v12 = vpop.f32.mrb[15].mxu1 }
 0x3b4   :  { %4261 = vtanh.f32 %v3749_v11 }
 0x3b5   :  { %4263 = vtanh.f32 %v3748_v10 }
 0x3be   :  { %v4262_v13 = vpop.eup %4261 }
 0x3bf   :  { %v4264_v14 = vpop.eup %4263  ;;  %2946 = vmatprep.mubr.f32.mxu0 %v4262_v13 }
 0x3c0   :  { %2947 = vmatmul.mubr.f32.vlgmr.msra.gmra.mrb[16].mxu0 %v4264_v14 }
 0x3d3   :  { %v3573_v37 = vpop.f32.mrb[12].mxu0 }
 0x3d4   :  { %v3574_v15 = vpop.f32.mrb[13].mxu0 }
 0x3d5   :  { %v3575_v16 = vadd.f32 %v3574_v15, %v3573_v37 }
 0x3d6   :  { %4409 = shalt.err (!%p4406_p10)
}
 0x3d7   :  { %s4410_s29 = scalar_lea.hbm %s4683_s7, 128 }
 0x3d8   :  { %p4411_p11 = scmp.ne.s32.totalorder %s4683_s7, %s4410_s29  ;;  %p4414_p12 = scmp.lt.u32.totalorder %s4410_s29, %s4683_s7 }
 0x3da   :  { %p4416_p13 = pnand %p4414_p12, %p4411_p11 }
 0x3dc   :  { %4419 = shalt.err (!%p4416_p13)
}
 0x3dd   :  { %2972 = dma.vmem_to_hbm [thread:$0]  %s2970_s0, 128, %s4683_s7, [#allocation15]   ;;  %v3301_v21 = vld [vmem:[#allocation11] ss:$0 sm:$0xff] }
 0x3de   :  { %v2809_v24 = vadd.f32 %v3575_v16, %v3301_v21  ;;  %s4467_s2 = smov [#allocation13]  }
 0x3df   :  { %s2959_s11 = sshll.u32 %s4467_s2, 4  ;;  %s2960_s11 = int_to_ptr.vmem [resolvable:$true] %s2959_s11 }
 0x3e0   :  { %s4420_s12 = scalar_lea.vmem %s2960_s11, 128  ;;  %p4425_p1 = scmp.lt.s32.totalorder %s2960_s11, %s2960_s11 }
 0x3e1   :  { %p4421_p0 = scmp.ne.s32.totalorder %s2960_s11, %s4420_s12  ;;  %p4426_p2 = scmp.lt.s32.totalorder %s4420_s12, %s4420_s12 }
 0x3e3   :  { %p4427_p3 = por %p4426_p2, %p4425_p1 }
 0x3e5   :  { %p4428_p4 = pnand %p4427_p3, %p4421_p0 }
 0x444   :  { %v3608_v22 = vpop.f32.mrb[14].mxu0 }
 0x445   :  { %v3609_v23 = vpop.f32.mrb[15].mxu0 }
 0x446   :  { %v3610_v44 = vadd.f32 %v3609_v23, %v3608_v22 }
 0x448   :  { %v2879_v56 = vadd.f32 %v3610_v44, %v2809_v24 }
 0x493   :  { %v3643_v25 = vpop.f32.mrb[16].mxu0 }
 0x494   :  { %v3644_v26 = vpop.f32.mrb[17].mxu0 }
 0x495   :  { %v3645_v27 = vadd.f32 %v3644_v26, %v3643_v25 }
 0x497   :  { %v2949_v28 = vadd.f32 %v3645_v27, %v2879_v56 }
 0x499   :  { %2952 = vst [vmem:[#allocation13] sm:$0xff] %v2949_v28 }
 0x49a   :  { %4431 = shalt.err (!%p4428_p4)
}
 0x49b   :  { %s4432_s15 = scalar_lea.hbm %s4682_s6, 128 }
 0x49c   :  { %p4433_p5 = scmp.ne.s32.totalorder %s4682_s6, %s4432_s15  ;;  %p4436_p6 = scmp.lt.u32.totalorder %s4432_s15, %s4682_s6 }
 0x49e   :  { %p4438_p7 = pnand %p4436_p6, %p4433_p5 }
 0x4a0   :  { %4441 = shalt.err (!%p4438_p7)
}
 0x4a1   :  { %2962 = dma.vmem_to_hbm [thread:$0]  %s2960_s11, 128, %s4682_s6, [#allocation4]  }
 0x4a2   :  { %4450 = dma.done.wait [#allocation4], 128  }
 0x4a3   :  { %4451 = vsyncadd [#allocation4], 4294967168 }
 0x4a4   :  { %4452 = dma.done.wait [#allocation15], 128  }
 0x4a5   :  { %4453 = vsyncadd [#allocation15], 4294967168 }
 0x4a6   :  { %2979 = vsyncpa [#allocation3], 1 }
 0x4a7   :  { %2980 = vsyncpa [#allocation6], 1 }
 0x4a8   :  { %2981 = vsyncpa [#allocation9], 1 }
 0x4a9   :  { %2982 = vsyncpa [#allocation12], 1 }
 0x4aa   :  { %2983 = vsyncpa [#allocation4], 1 }
 0x4ab   :  { %2984 = vsyncpa [#allocation15], 1 }

</bundles_post_ra>
